<compile_context>
chip_gen: v7x
topology: tpu7x:2x2x1
jax: 0.10.0
libtpu: 0.0.40
codegen_flags: <defaults>
</compile_context>

<pallas_src>
import functools

import numpy as np
import jax
import jax.numpy as jnp
from jax import lax
from jax.experimental import pallas as pl
from jax.experimental.pallas import tpu as pltpu


def _shift_rows(a, delta, rows_out):
    """b[i, :] = a[i + delta, :] if 0 <= i + delta < a.shape[0] else 0, for i in [0, rows_out)."""
    n = a.shape[0]
    if delta == 0 and rows_out == n:
        return a
    lo = max(delta, 0)
    hi = min(n, rows_out + delta)
    pad_top = max(-delta, 0)
    core_len = max(hi - lo, 0)
    pad_bot = rows_out - pad_top - core_len
    parts = []
    if pad_top > 0:
        parts.append(jnp.zeros((pad_top, a.shape[1]), a.dtype))
    if core_len > 0:
        parts.append(a[lo:hi])
    if pad_bot > 0:
        parts.append(jnp.zeros((pad_bot, a.shape[1]), a.dtype))
    return parts[0] if len(parts) == 1 else jnp.concatenate(parts, axis=0)


def _fused_convt_kernel(x_ref, w_ref, cb_ref, bb_ref, o_ref, *,
                        h_res, rd_taps, OHq, ODq, OWC, stride):
    """One grid step = one batch element.

    x_ref : (1, n_h, D*OHq, W*Cin)        per-height-tap LHS slabs (W & Cin folded into lanes)
    w_ref : (n_h, W*Cin, K*OW*Cout)       banded weights; depth taps (kd) folded into N
    cb_ref: (1, OW*Cout)                  conv bias tiled over OW
    bb_ref: (1, OW*Cout)                  extra bias tiled over OW
    o_ref : (1, stride, stride, ODq*OHq, OW*Cout)   (depth-residue, height-residue) layout
    """
    cb = cb_ref[...]
    bb = bb_ref[...]
    rows_out = ODq * OHq

    # One MXU matmul per height tap: (D*OHq, WC) @ (WC, K*OWC); group results by h-residue.
    y_by_r = {}
    for t, r in enumerate(h_res):
        y = jnp.dot(x_ref[0, t], w_ref[t], preferred_element_type=jnp.float32)
        y_by_r[r] = y if r not in y_by_r else y_by_r[r] + y

    # Route depth-kernel column blocks into (depth-residue, height-residue) output slabs.
    for rd in range(stride):
        for r in range(stride):
            acc = None
            yg = y_by_r.get(r)
            if yg is not None:
                for (kd, delta) in rd_taps[rd]:
                    blk = _shift_rows(yg[:, kd * OWC:(kd + 1) * OWC],
                                      delta * OHq, rows_out)
                    acc = blk if acc is None else acc + blk
            if acc is None:
                acc = jnp.zeros((rows_out, OWC), jnp.float32)
            yv = acc + cb                       # conv_transpose3d output (incl. conv bias)
            out = (2.0 * yv + bb) * yv + yv     # ((y + b) + y) * y + y
            o_ref[0, rd, r] = out.astype(o_ref.dtype)


def prepare_model(conv_w, conv_b, bias, x_shape, *, stride, padding, output_padding):
    """One-time (init-time) weight/bias preparation + static geometry tables."""
    B, Cin, D, H, W = x_shape
    Cin_w, Cout, K, K2, K3 = conv_w.shape
    assert Cin_w == Cin and K == K2 == K3
    OD = (D - 1) * stride - 2 * padding + K + output_padding
    OH = (H - 1) * stride - 2 * padding + K + output_padding
    OW = (W - 1) * stride - 2 * padding + K + output_padding
    assert OD % stride == 0 and OH % stride == 0, "kernel assumes OD/OH divisible by stride"
    OHq, ODq = OH // stride, OD // stride
    WC, OWC = W * Cin, OW * Cout

    # Height taps: for kh with residue r, output rows (r, q=0..OHq-1) read input row ih0+q.
    h_taps = []
    Hpad = H
    for kh in range(K):
        ihs = [ih for ih in range(H) if 0 <= ih * stride - padding + kh < OH]
        if not ihs:
            continue
        assert ihs == list(range(ihs[0], ihs[-1] + 1)), "non-contiguous height taps"
        oh_lo = ihs[0] * stride - padding + kh
        r, q_lo = oh_lo % stride, oh_lo // stride
        assert q_lo == 0, "unsupported conv-transpose geometry"
        h_taps.append((kh, ihs[0], r))
        Hpad = max(Hpad, ihs[0] + OHq)
    h_taps = tuple(h_taps)

    # Depth routing: output depth od = m*stride + rd reads input depth m + delta per kd.
    rd_taps = []
    for rd in range(stride):
        taps = []
        for kd in range(K):
            if (rd + padding - kd) % stride == 0:
                delta = (rd + padding - kd) // stride
                if -ODq < delta < D:      # otherwise never in range -> contributes nothing
                    taps.append((kd, delta))
        rd_taps.append(tuple(taps))
    rd_taps = tuple(rd_taps)

    # Banded weight: fold (width taps, Cin) into the contraction and kd into the N axis:
    #   w3[t, iw*Cin + c, kd*OWC + ow*Cout + co] = w[c, co, kd, kh_t, kw], kw = ow + p - iw*s
    sel = np.zeros((K, W, OW), np.float32)
    for kw in range(K):
        for iw in range(W):
            ow = iw * stride - padding + kw
            if 0 <= ow < OW:
                sel[kw, iw, ow] = 1.0
    w2 = jnp.einsum('kwo,cnabk->abwcon', jnp.asarray(sel), conv_w.astype(jnp.float32))
    w2 = w2.reshape(K, K, WC, OWC)                                   # (kd, kh, WC, OWC)
    w2 = jnp.transpose(w2, (1, 2, 0, 3)).reshape(K, WC, K * OWC)     # (kh, WC, K*OWC)
    w3 = jnp.stack([w2[kh] for (kh, _, _) in h_taps])                # (n_h, WC, K*OWC)

    cb_row = jnp.tile(conv_b.astype(jnp.float32).reshape(-1), OW).reshape(1, OWC)
    bb_row = jnp.tile(bias.astype(jnp.float32).reshape(-1), OW).reshape(1, OWC)

    params = (w3, cb_row, bb_row)
    geom = dict(stride=stride, h_taps=h_taps, rd_taps=rd_taps,
                D=D, H=H, W=W, Cin=Cin, Cout=Cout, K=K,
                OD=OD, OH=OH, OW=OW, Hpad=Hpad)
    return params, geom


def fused_forward(x, w3, cb_row, bb_row, *, stride, h_taps, rd_taps,
                  D, H, W, Cin, Cout, K, OD, OH, OW, Hpad):
    B = x.shape[0]
    OHq, ODq = OH // stride, OD // stride
    WC, OWC = W * Cin, OW * Cout
    n_h = len(h_taps)

    # Input: NCDHW -> (B, D, Hpad, W*Cin), then one LHS slab per height tap.
    x2 = jnp.transpose(x, (0, 2, 3, 4, 1)).reshape(B, D, H, WC).astype(jnp.float32)
    if Hpad > H:
        x2 = jnp.pad(x2, ((0, 0), (0, 0), (0, Hpad - H), (0, 0)))
    x3 = jnp.stack([x2[:, :, ih0:ih0 + OHq, :].reshape(B, D * OHq, WC)
                    for (_, ih0, _) in h_taps], axis=1)       # (B, n_h, D*OHq, WC)

    kernel = functools.partial(
        _fused_convt_kernel,
        h_res=tuple(r for (_, _, r) in h_taps), rd_taps=rd_taps,
        OHq=OHq, ODq=ODq, OWC=OWC, stride=stride)

    out_k = pl.pallas_call(
        kernel,
        out_shape=jax.ShapeDtypeStruct((B, stride, stride, ODq * OHq, OWC), jnp.float32),
        grid=(B,),
        in_specs=[
            pl.BlockSpec((1, n_h, D * OHq, WC), lambda b: (b, 0, 0, 0)),
            pl.BlockSpec((n_h, WC, K * OWC), lambda b: (0, 0, 0)),
            pl.BlockSpec((1, OWC), lambda b: (0, 0)),
            pl.BlockSpec((1, OWC), lambda b: (0, 0)),
        ],
        out_specs=pl.BlockSpec((1, stride, stride, ODq * OHq, OWC),
                               lambda b: (b, 0, 0, 0, 0)),
        compiler_params=pltpu.CompilerParams(
            dimension_semantics=("parallel",)),
    )(x3, w3, cb_row, bb_row)

    # (B, rd, r, m*OHq+q, OW*Cout) -> (B, Cout, OD = m*stride+rd, OH = q*stride+r, OW)
    out = out_k.reshape(B, stride, stride, ODq, OHq, OW, Cout)
    out = jnp.transpose(out, (0, 6, 3, 1, 4, 2, 5)).reshape(B, Cout, OD, OH, OW)
    return out.astype(x.dtype)


def reference(x, conv_w, conv_b, bias, *, stride, padding, output_padding):
    """Pure-JAX reference (NCDHW) for the full forward pass."""
    Cout, K = conv_w.shape[1], conv_w.shape[2]
    rhs = jnp.transpose(conv_w[:, :, ::-1, ::-1, ::-1], (1, 0, 2, 3, 4))  # (Cout,Cin,K,K,K)
    lo = K - 1 - padding
    hi = K - 1 - padding + output_padding
    y = lax.conv_general_dilated(
        x, rhs, window_strides=(1, 1, 1), padding=[(lo, hi)] * 3,
        lhs_dilation=(stride, stride, stride),
        dimension_numbers=('NCDHW', 'OIDHW', 'NCDHW'))
    y = y + conv_b[None, :, None, None, None]
    b = bias.reshape(1, Cout, 1, 1, 1)
    t = y + b
    t = t + y
    t = t * y
    t = t + y
    return t


if __name__ == "__main__":
    in_channels, out_channels, kernel_size = 32, 64, 3
    stride, padding, output_padding = 2, 1, 1
    B, D, H, W = 2, 4, 4, 4

    key = jax.random.PRNGKey(0)
    kx, kw, kb1, kb2 = jax.random.split(key, 4)

    x = jax.random.normal(kx, (B, in_channels, D, H, W), jnp.float32)
    # ConvTranspose3d weight layout: (in_channels, out_channels, kD, kH, kW)
    conv_w = jax.random.normal(
        kw, (in_channels, out_channels, kernel_size, kernel_size, kernel_size),
        jnp.float32) * 0.05
    conv_b = jax.random.normal(kb1, (out_channels,), jnp.float32) * 0.05 + 0.02
    bias = jax.random.normal(kb2, (out_channels, 1, 1, 1), jnp.float32) * 0.02

    # One-time weight prep (hoisted out of the per-call hot path).
    (w3, cb_row, bb_row), geom = prepare_model(
        conv_w, conv_b, bias, x.shape,
        stride=stride, padding=padding, output_padding=output_padding)

    fwd = jax.jit(functools.partial(fused_forward, **geom))
    out = jax.block_until_ready(fwd(x, w3, cb_row, bb_row))

    ref = reference(x, conv_w, conv_b, bias,
                    stride=stride, padding=padding,
                    output_padding=output_padding)
    np.testing.assert_allclose(np.asarray(out), np.asarray(ref),
                               rtol=1e-4, atol=1e-4)
    print("KERNEL_OK")
</pallas_src>

<mosaic_0001>
module attributes {stable_mosaic.version = 11 : i64} {
  func.func @_fused_convt_kernel(%arg0: i32, %arg1: memref<1x3x16x128xf32, #tpu.memory_space<vmem>>, %arg2: memref<3x128x1536xf32, #tpu.memory_space<vmem>>, %arg3: memref<1x512xf32, #tpu.memory_space<vmem>>, %arg4: memref<1x512xf32, #tpu.memory_space<vmem>>, %arg5: memref<1x2x2x16x512xf32, #tpu.memory_space<vmem>>) attributes {dimension_semantics = [#tpu.dimension_semantics<parallel>], iteration_bounds = array<i64: 2>, scalar_prefetch = 0 : i64, scratch_operands = 0 : i64, tpu.core_type = #tpu.core_type<tc>, window_params = [{transform_indices = @transform_0, window_bounds = array<i64: 1, 3, 16, 128>}, {pipeline_mode = #tpu.pipeline_mode<synchronous>, transform_indices = @transform_1, window_bounds = array<i64: 3, 128, 1536>}, {pipeline_mode = #tpu.pipeline_mode<synchronous>, transform_indices = @transform_2, window_bounds = array<i64: 1, 512>}, {pipeline_mode = #tpu.pipeline_mode<synchronous>, transform_indices = @transform_3, window_bounds = array<i64: 1, 512>}, {transform_indices = @transform_4, window_bounds = array<i64: 1, 2, 2, 16, 512>}]} {
    %c0 = arith.constant 0 : index
    %c0_0 = arith.constant 0 : index
    %0 = vector.load %arg3[%c0, %c0_0] : memref<1x512xf32, #tpu.memory_space<vmem>>, vector<1x512xf32>
    %c0_1 = arith.constant 0 : index
    %c0_2 = arith.constant 0 : index
    %1 = vector.load %arg4[%c0_1, %c0_2] : memref<1x512xf32, #tpu.memory_space<vmem>>, vector<1x512xf32>
    %c0_3 = arith.constant 0 : index
    %c0_4 = arith.constant 0 : index
    %c0_5 = arith.constant 0 : index
    %c0_6 = arith.constant 0 : index
    %2 = vector.load %arg1[%c0_3, %c0_4, %c0_5, %c0_6] : memref<1x3x16x128xf32, #tpu.memory_space<vmem>>, vector<1x1x16x128xf32>
    %3 = vector.shape_cast %2 : vector<1x1x16x128xf32> to vector<16x128xf32>
    %c0_7 = arith.constant 0 : index
    %c0_8 = arith.constant 0 : index
    %c0_9 = arith.constant 0 : index
    %4 = vector.load %arg2[%c0_7, %c0_8, %c0_9] : memref<3x128x1536xf32, #tpu.memory_space<vmem>>, vector<1x128x1536xf32>
    %5 = vector.shape_cast %4 : vector<1x128x1536xf32> to vector<128x1536xf32>
    %cst = arith.constant dense<0.000000e+00> : vector<16x1536xf32>
    %6 = tpu.matmul %3, %5, %cst {dimension_numbers = #tpu.dot_dimension_numbers<[1], [0], [0], [1], [0, 0, 1, 1], [], []>} : vector<16x128xf32>, vector<128x1536xf32>, vector<16x1536xf32> -> vector<16x1536xf32>
    %c0_10 = arith.constant 0 : index
    %c1 = arith.constant 1 : index
    %c0_11 = arith.constant 0 : index
    %c0_12 = arith.constant 0 : index
    %7 = vector.load %arg1[%c0_10, %c1, %c0_11, %c0_12] : memref<1x3x16x128xf32, #tpu.memory_space<vmem>>, vector<1x1x16x128xf32>
    %8 = vector.shape_cast %7 : vector<1x1x16x128xf32> to vector<16x128xf32>
    %c1_13 = arith.constant 1 : index
    %c0_14 = arith.constant 0 : index
    %c0_15 = arith.constant 0 : index
    %9 = vector.load %arg2[%c1_13, %c0_14, %c0_15] : memref<3x128x1536xf32, #tpu.memory_space<vmem>>, vector<1x128x1536xf32>
    %10 = vector.shape_cast %9 : vector<1x128x1536xf32> to vector<128x1536xf32>
    %cst_16 = arith.constant dense<0.000000e+00> : vector<16x1536xf32>
    %11 = tpu.matmul %8, %10, %cst_16 {dimension_numbers = #tpu.dot_dimension_numbers<[1], [0], [0], [1], [0, 0, 1, 1], [], []>} : vector<16x128xf32>, vector<128x1536xf32>, vector<16x1536xf32> -> vector<16x1536xf32>
    %c0_17 = arith.constant 0 : index
    %c2 = arith.constant 2 : index
    %c0_18 = arith.constant 0 : index
    %c0_19 = arith.constant 0 : index
    %12 = vector.load %arg1[%c0_17, %c2, %c0_18, %c0_19] : memref<1x3x16x128xf32, #tpu.memory_space<vmem>>, vector<1x1x16x128xf32>
    %13 = vector.shape_cast %12 : vector<1x1x16x128xf32> to vector<16x128xf32>
    %c2_20 = arith.constant 2 : index
    %c0_21 = arith.constant 0 : index
    %c0_22 = arith.constant 0 : index
    %14 = vector.load %arg2[%c2_20, %c0_21, %c0_22] : memref<3x128x1536xf32, #tpu.memory_space<vmem>>, vector<1x128x1536xf32>
    %15 = vector.shape_cast %14 : vector<1x128x1536xf32> to vector<128x1536xf32>
    %cst_23 = arith.constant dense<0.000000e+00> : vector<16x1536xf32>
    %16 = tpu.matmul %13, %15, %cst_23 {dimension_numbers = #tpu.dot_dimension_numbers<[1], [0], [0], [1], [0, 0, 1, 1], [], []>} : vector<16x128xf32>, vector<128x1536xf32>, vector<16x1536xf32> -> vector<16x1536xf32>
    %17 = arith.addf %6, %16 : vector<16x1536xf32>
    %18 = vector.extract_strided_slice %11 {offsets = [0, 512], sizes = [16, 512], strides = [1, 1]} : vector<16x1536xf32> to vector<16x512xf32>
    %19 = vector.broadcast %0 : vector<1x512xf32> to vector<16x512xf32>
    %20 = arith.addf %18, %19 : vector<16x512xf32>
    %cst_24 = arith.constant 2.000000e+00 : f32
    %21 = vector.broadcast %cst_24 : f32 to vector<16x512xf32>
    %22 = arith.mulf %21, %20 : vector<16x512xf32>
    %23 = vector.broadcast %1 : vector<1x512xf32> to vector<16x512xf32>
    %24 = arith.addf %22, %23 : vector<16x512xf32>
    %25 = arith.mulf %24, %20 : vector<16x512xf32>
    %26 = arith.addf %25, %20 : vector<16x512xf32>
    %c0_25 = arith.constant 0 : index
    %c0_26 = arith.constant 0 : index
    %c0_27 = arith.constant 0 : index
    %c0_28 = arith.constant 0 : index
    %c0_29 = arith.constant 0 : index
    %27 = vector.load %arg5[%c0_25, %c0_26, %c0_27, %c0_28, %c0_29] : memref<1x2x2x16x512xf32, #tpu.memory_space<vmem>>, vector<1x1x1x16x512xf32>
    %28 = vector.shape_cast %27 : vector<1x1x1x16x512xf32> to vector<16x512xf32>
    %29 = vector.shape_cast %26 : vector<16x512xf32> to vector<1x1x1x16x512xf32>
    tpu.vector_store %arg5[%c0_25, %c0_26, %c0_27, %c0_28, %c0_29], %29 {strides = array<i32>} : memref<1x2x2x16x512xf32, #tpu.memory_space<vmem>>, vector<1x1x1x16x512xf32>,
    %30 = vector.extract_strided_slice %17 {offsets = [0, 512], sizes = [16, 512], strides = [1, 1]} : vector<16x1536xf32> to vector<16x512xf32>
    %31 = vector.broadcast %0 : vector<1x512xf32> to vector<16x512xf32>
    %32 = arith.addf %30, %31 : vector<16x512xf32>
    %cst_30 = arith.constant 2.000000e+00 : f32
    %33 = vector.broadcast %cst_30 : f32 to vector<16x512xf32>
    %34 = arith.mulf %33, %32 : vector<16x512xf32>
    %35 = vector.broadcast %1 : vector<1x512xf32> to vector<16x512xf32>
    %36 = arith.addf %34, %35 : vector<16x512xf32>
    %37 = arith.mulf %36, %32 : vector<16x512xf32>
    %38 = arith.addf %37, %32 : vector<16x512xf32>
    %c0_31 = arith.constant 0 : index
    %c0_32 = arith.constant 0 : index
    %c1_33 = arith.constant 1 : index
    %c0_34 = arith.constant 0 : index
    %c0_35 = arith.constant 0 : index
    %39 = vector.load %arg5[%c0_31, %c0_32, %c1_33, %c0_34, %c0_35] : memref<1x2x2x16x512xf32, #tpu.memory_space<vmem>>, vector<1x1x1x16x512xf32>
    %40 = vector.shape_cast %39 : vector<1x1x1x16x512xf32> to vector<16x512xf32>
    %41 = vector.shape_cast %38 : vector<16x512xf32> to vector<1x1x1x16x512xf32>
    tpu.vector_store %arg5[%c0_31, %c0_32, %c1_33, %c0_34, %c0_35], %41 {strides = array<i32>} : memref<1x2x2x16x512xf32, #tpu.memory_space<vmem>>, vector<1x1x1x16x512xf32>,
    %42 = vector.extract_strided_slice %11 {offsets = [0, 0], sizes = [16, 512], strides = [1, 1]} : vector<16x1536xf32> to vector<16x512xf32>
    %43 = vector.extract_strided_slice %42 {offsets = [4, 0], sizes = [12, 512], strides = [1, 1]} : vector<16x512xf32> to vector<12x512xf32>
    %cst_36 = arith.constant 0.000000e+00 : f32
    %44 = vector.broadcast %cst_36 : f32 to vector<4x512xf32>
    %45 = tpu.concatenate %43, %44 in 0 : vector<12x512xf32>, vector<4x512xf32> -> vector<16x512xf32>
    %46 = vector.extract_strided_slice %11 {offsets = [0, 1024], sizes = [16, 512], strides = [1, 1]} : vector<16x1536xf32> to vector<16x512xf32>
    %47 = arith.addf %45, %46 : vector<16x512xf32>
    %48 = vector.broadcast %0 : vector<1x512xf32> to vector<16x512xf32>
    %49 = arith.addf %47, %48 : vector<16x512xf32>
    %cst_37 = arith.constant 2.000000e+00 : f32
    %50 = vector.broadcast %cst_37 : f32 to vector<16x512xf32>
    %51 = arith.mulf %50, %49 : vector<16x512xf32>
    %52 = vector.broadcast %1 : vector<1x512xf32> to vector<16x512xf32>
    %53 = arith.addf %51, %52 : vector<16x512xf32>
    %54 = arith.mulf %53, %49 : vector<16x512xf32>
    %55 = arith.addf %54, %49 : vector<16x512xf32>
    %c0_38 = arith.constant 0 : index
    %c1_39 = arith.constant 1 : index
    %c0_40 = arith.constant 0 : index
    %c0_41 = arith.constant 0 : index
    %c0_42 = arith.constant 0 : index
    %56 = vector.load %arg5[%c0_38, %c1_39, %c0_40, %c0_41, %c0_42] : memref<1x2x2x16x512xf32, #tpu.memory_space<vmem>>, vector<1x1x1x16x512xf32>
    %57 = vector.shape_cast %56 : vector<1x1x1x16x512xf32> to vector<16x512xf32>
    %58 = vector.shape_cast %55 : vector<16x512xf32> to vector<1x1x1x16x512xf32>
    tpu.vector_store %arg5[%c0_38, %c1_39, %c0_40, %c0_41, %c0_42], %58 {strides = array<i32>} : memref<1x2x2x16x512xf32, #tpu.memory_space<vmem>>, vector<1x1x1x16x512xf32>,
    %59 = vector.extract_strided_slice %17 {offsets = [0, 0], sizes = [16, 512], strides = [1, 1]} : vector<16x1536xf32> to vector<16x512xf32>
    %60 = vector.extract_strided_slice %59 {offsets = [4, 0], sizes = [12, 512], strides = [1, 1]} : vector<16x512xf32> to vector<12x512xf32>
    %cst_43 = arith.constant 0.000000e+00 : f32
    %61 = vector.broadcast %cst_43 : f32 to vector<4x512xf32>
    %62 = tpu.concatenate %60, %61 in 0 : vector<12x512xf32>, vector<4x512xf32> -> vector<16x512xf32>
    %63 = vector.extract_strided_slice %17 {offsets = [0, 1024], sizes = [16, 512], strides = [1, 1]} : vector<16x1536xf32> to vector<16x512xf32>
    %64 = arith.addf %62, %63 : vector<16x512xf32>
    %65 = vector.broadcast %0 : vector<1x512xf32> to vector<16x512xf32>
    %66 = arith.addf %64, %65 : vector<16x512xf32>
    %cst_44 = arith.constant 2.000000e+00 : f32
    %67 = vector.broadcast %cst_44 : f32 to vector<16x512xf32>
    %68 = arith.mulf %67, %66 : vector<16x512xf32>
    %69 = vector.broadcast %1 : vector<1x512xf32> to vector<16x512xf32>
    %70 = arith.addf %68, %69 : vector<16x512xf32>
    %71 = arith.mulf %70, %66 : vector<16x512xf32>
    %72 = arith.addf %71, %66 : vector<16x512xf32>
    %c0_45 = arith.constant 0 : index
    %c1_46 = arith.constant 1 : index
    %c1_47 = arith.constant 1 : index
    %c0_48 = arith.constant 0 : index
    %c0_49 = arith.constant 0 : index
    %73 = vector.load %arg5[%c0_45, %c1_46, %c1_47, %c0_48, %c0_49] : memref<1x2x2x16x512xf32, #tpu.memory_space<vmem>>, vector<1x1x1x16x512xf32>
    %74 = vector.shape_cast %73 : vector<1x1x1x16x512xf32> to vector<16x512xf32>
    %75 = vector.shape_cast %72 : vector<16x512xf32> to vector<1x1x1x16x512xf32>
    tpu.vector_store %arg5[%c0_45, %c1_46, %c1_47, %c0_48, %c0_49], %75 {strides = array<i32>} : memref<1x2x2x16x512xf32, #tpu.memory_space<vmem>>, vector<1x1x1x16x512xf32>,
    return
  }
  func.func @transform_0(%arg0: i32) -> (i32, i32, i32, i32) {
    %c0_i32 = arith.constant 0 : i32
    %c0_i32_0 = arith.constant 0 : i32
    %c0_i32_1 = arith.constant 0 : i32
    %c0_i32_2 = arith.constant 0 : i32
    return %arg0, %c0_i32, %c0_i32_0, %c0_i32_1 : i32, i32, i32, i32
  }
  func.func @transform_1(%arg0: i32) -> (i32, i32, i32) {
    %c0_i32 = arith.constant 0 : i32
    %c0_i32_0 = arith.constant 0 : i32
    %c0_i32_1 = arith.constant 0 : i32
    %c0_i32_2 = arith.constant 0 : i32
    return %c0_i32, %c0_i32_0, %c0_i32_1 : i32, i32, i32
  }
  func.func @transform_2(%arg0: i32) -> (i32, i32) {
    %c0_i32 = arith.constant 0 : i32
    %c0_i32_0 = arith.constant 0 : i32
    %c0_i32_1 = arith.constant 0 : i32
    return %c0_i32, %c0_i32_0 : i32, i32
  }
  func.func @transform_3(%arg0: i32) -> (i32, i32) {
    %c0_i32 = arith.constant 0 : i32
    %c0_i32_0 = arith.constant 0 : i32
    %c0_i32_1 = arith.constant 0 : i32
    return %c0_i32, %c0_i32_0 : i32, i32
  }
  func.func @transform_4(%arg0: i32) -> (i32, i32, i32, i32, i32) {
    %c0_i32 = arith.constant 0 : i32
    %c0_i32_0 = arith.constant 0 : i32
    %c0_i32_1 = arith.constant 0 : i32
    %c0_i32_2 = arith.constant 0 : i32
    %c0_i32_3 = arith.constant 0 : i32
    return %arg0, %c0_i32, %c0_i32_0, %c0_i32_1, %c0_i32_2 : i32, i32, i32, i32, i32
  }
}

</mosaic_0001>

<bundles_post_ra>
// kernel: fused_forward.1
= control target key start
LH: loop header
LB: loop body
LE: loop exit
PB: predicated region body
PF: predicated region fallthrough
CT: control target
= control target key end

     0   :  { %9 = vsyncpa [#allocation3], 0  ;;  %s3864_s0 = inlined_call_operand.vmem [shape: f32[2,3,16,128], index: 0, kind: input, shape index: {}]   ;;  %s3865_s1 = inlined_call_operand.hbm [shape: f32[3,128,1536], index: 1, kind: input, shape index: {}]   ;;  %s3866_s2 = inlined_call_operand.hbm [shape: f32[1,512], index: 2, kind: input, shape index: {}]   ;;  %s3867_s3 = inlined_call_operand.hbm [shape: f32[1,512], index: 3, kind: input, shape index: {}]   ;;  %s3868_s4 = inlined_call_operand.vmem [shape: f32[2,2,2,16,512], index: 4, kind: output, shape index: {}]  }
   0x1   :  { %10 = vsyncpa [#allocation5], 0  ;;  %s3435_s15 = smov 0  }
   0x2 LB: > { %s3404_s16 = smov [#allocation4]   ;;  %s3441_s18 = sadd.s32 4294967295, %s3402_s15   ;;  %s3402_s15 = sphi %s3435_s15, %s16_s15  }
   0x3   : > { %s162_s17 = sshll.u32 %s3404_s16, 4  ;;  %p2618_p0 = scmp.ge.s32.totalorder %s3402_s15, 1  ;;  %s163_s17 = int_to_ptr.vmem [resolvable:$true] %s162_s17 }
   0x4   : > { %p136_p1 = scmp.lt.s32.totalorder %s3402_s15, 3  ;;  %p3869_p2 = scmp.eq.s32.totalorder %s3441_s18, 0 }
   0x5   : > { %s3405_s20 = smov [#allocation2]   ;;  %s3406_s23 = smov [#allocation6]  }
   0x6   : > { %p3446_p3 = pnand %p2618_p0, %p136_p1  ;;  %s148_s21 = sshll.u32 %s3405_s20, 4  ;;  %s3458_s21 = int_to_ptr.vmem [resolvable:$true] %s148_s21 }
   0x7   : > { %s173_s24 = sshll.u32 %s3406_s23, 4  ;;  %s3304_s27 = scalar_lea.hbm %s3866_s2, 64  ;;  %s3460_s24 = int_to_ptr.vmem [resolvable:$true] %s173_s24 }
   0x8   : > { %s3871_s19 = scalar_select %p3446_p3, 1, 0 }
   0x9   : > { %p3274_p4 = pneg %p3446_p3  ;;  %p3305_p6 = scmp.ne.s32.totalorder %s3866_s2, %s3304_s27 }
   0xa   : > { %p3311_p10 = scmp.lt.u32.totalorder %s3304_s27, %s3866_s2 }
   0xb   : > { %p3454_p5 = pnand %p3869_p2, %p3274_p4 }
   0xd   : > { %p3470_p7 = pneg %p3454_p5 }
   0xf   : > { %p3307_p8 = pnand %p3470_p7, %p3305_p6 }
  0x11   : > { %p3308_p9 = pneg %p3307_p8 }
  0x13   : > { %p3313_p11 = pnand %p3311_p10, %p3308_p9 }
  0x15   : > { %3316 = shalt.err (!%p3313_p11)
}
  0x16   : > { %s3317_s7 = scalar_lea.vmem %s163_s17, 64  ;;  %p3325_p1 = scmp.lt.s32.totalorder %s163_s17, %s163_s17 }
  0x17   : > { %p3318_p12 = scmp.ne.s32.totalorder %s163_s17, %s3317_s7  ;;  %p3326_p4 = scmp.lt.s32.totalorder %s3317_s7, %s3317_s7 }
  0x19   : > { %p3320_p13 = pnand %p3318_p12, %p3470_p7  ;;  %p3327_p2 = por %p3326_p4, %p3325_p1 }
  0x1b   : > { %p3321_p0 = pneg %p3320_p13 }
  0x1d   : > { %p3328_p3 = pnand %p3327_p2, %p3321_p0 }
  0x1f   : > { %3331 = shalt.err (!%p3328_p3)
}
  0x20   : > { %3280 = dma.hbm_to_vmem [thread:$0]  (!%p3454_p5), %s3866_s2, 64, %s163_s17, [#allocation5]  }
  0x21   : > { %s3332_s12 = scalar_lea.hbm %s3865_s1, 73728 }
  0x22   : > { %p3333_p6 = scmp.ne.s32.totalorder %s3865_s1, %s3332_s12  ;;  %p3339_p2 = scmp.lt.u32.totalorder %s3332_s12, %s3865_s1 }
  0x24   : > { %p3335_p8 = pnand %p3333_p6, %p3470_p7 }
  0x26   : > { %p3336_p9 = pneg %p3335_p8 }
  0x28   : > { %p3341_p3 = pnand %p3339_p2, %p3336_p9 }
  0x2a   : > { %3344 = shalt.err (!%p3341_p3)
}
  0x2b   : > { %s3345_s17 = scalar_lea.vmem %s3458_s21, 73728  ;;  %p3353_p13 = scmp.lt.s32.totalorder %s3458_s21, %s3458_s21 }
  0x2c   : > { %p3346_p10 = scmp.ne.s32.totalorder %s3458_s21, %s3345_s17  ;;  %p3354_p0 = scmp.lt.s32.totalorder %s3345_s17, %s3345_s17 }
  0x2e   : > { %p3348_p11 = pnand %p3346_p10, %p3470_p7  ;;  %p3355_p1 = por %p3354_p0, %p3353_p13 }
  0x30   : > { %p3349_p12 = pneg %p3348_p11 }
  0x32   : > { %p3356_p4 = pnand %p3355_p1, %p3349_p12 }
  0x34   : > { %3359 = shalt.err (!%p3356_p4)
}
  0x35   : > { %s3407_s23 = smov 1536   ;;  %s3408_s25 = smov 96  }
  0x36   : > { %3277 = dma.hbm_to_vmem [thread:$0]  (!%p3454_p5), %s3865_s1, 73728, %s3458_s21, [#allocation3], %s3407_s23, %s3407_s23, %s3408_s25  }
  0x37   : > { %s3360_s5 = scalar_lea.hbm %s3867_s3, 64 }
  0x38   : > { %p3361_p6 = scmp.ne.s32.totalorder %s3867_s3, %s3360_s5  ;;  %p3367_p2 = scmp.lt.u32.totalorder %s3360_s5, %s3867_s3 }
  0x3a   : > { %p3363_p8 = pnand %p3361_p6, %p3470_p7 }
  0x3c   : > { %p3364_p9 = pneg %p3363_p8 }
  0x3e   : > { %p3369_p3 = pnand %p3367_p2, %p3364_p9 }
  0x40   : > { %3372 = shalt.err (!%p3369_p3)
}
  0x41   : > { %s3373_s21 = scalar_lea.vmem %s3460_s24, 64  ;;  %p3381_p13 = scmp.lt.s32.totalorder %s3460_s24, %s3460_s24 }
  0x42   : > { %p3374_p10 = scmp.ne.s32.totalorder %s3460_s24, %s3373_s21  ;;  %p3382_p0 = scmp.lt.s32.totalorder %s3373_s21, %s3373_s21 }
  0x44   : > { %p3376_p11 = pnand %p3374_p10, %p3470_p7  ;;  %p3383_p1 = por %p3382_p0, %p3381_p13 }
  0x46   : > { %p3377_p12 = pneg %p3376_p11 }
  0x48   : > { %p3384_p4 = pnand %p3383_p1, %p3377_p12 }
  0x4a   : > { %3387 = shalt.err (!%p3384_p4)
}
  0x4b   : > { %3283 = dma.hbm_to_vmem [thread:$0]  (!%p3454_p5), %s3867_s3, 64, %s3460_s24, [#allocation5]  }
  0x4c   : > { %p3874_p6 = scmp.ne.s32.totalorder %s3871_s19, 0 }
  0x4d   : > { %p3875_p8 = scmp.eq.s32.totalorder (!%p3874_p6), %s3441_s18, 0 }
  0x4e   : > { %194 = sbr.rel (%p3874_p6) target bundleno = 613 (0x265), region = 36 }
  0x55   : > { %3393 = dma.done.wait (%p3875_p8), [#allocation3], 73728   ;;  %p3876_p7 = pmov %p3875_p8 }
  0x57   : > { %3395 = vsyncadd (%p3876_p7), [#allocation3], 4294893568  ;;  %p3877_p9 = pmov %p3876_p7 }
  0x58   : > { %p3878_p2 = pmov %p3876_p7 }
  0x59   : > { %3397 = dma.done.wait (%p3877_p9), [#allocation5], 128  }
  0x5a   : > { %3399 = vsyncadd (%p3878_p2), [#allocation5], 4294967168  ;;  %v3409_v0 = vmov 0.0   ;;  %v439_v1 = vld [vmem:[#allocation2 + $0x608] sm:$0xff]  ;;  %v441_v3 = vld [vmem:[#allocation2 + $0x618] sm:$0xff]  ;;  %p228_p5 = scmp.lt.s32.totalorder %s3441_s18, 1 }
  0x5b   : > { %694 = vmatprep.mubr.f32.mxu0 %v3409_v0  ;;  %771 = vmatprep.mubr.f32.mxu1 %v3409_v0  ;;  %v451_v2 = vld [vmem:[#allocation2 + $0x668] sm:$0xff]  ;;  %v453_v5 = vld [vmem:[#allocation2 + $0x678] sm:$0xff]  ;;  %v438_v6 = vld [vmem:[#allocation2 + $0x600] sm:$0xff]  ;;  %vm2359_vm0 = vcmask 1043456  }
  0x5c   : > { %v2661_v4 = vpack.c.bf16 %v451_v2, %v439_v1  ;;  %v450_v7 = vld [vmem:[#allocation2 + $0x660] sm:$0xff]  ;;  %v2693_v8 = vpack.c.bf16 %v453_v5, %v441_v3  ;;  %v440_v10 = vld [vmem:[#allocation2 + $0x610] sm:$0xff]  ;;  %v463_v12 = vld [vmem:[#allocation2 + $0x6c8] sm:$0xff]  ;;  %s3880_s18 = smov (!%p228_p5, %s3441_s18), 1 }
  0x5d   : > { %v2663_v9 = vpack.c.bf16 %v450_v7, %v438_v6  ;;  %v452_v11 = vld [vmem:[#allocation2 + $0x670] sm:$0xff]  ;;  %v475_v14 = vld [vmem:[#allocation2 + $0x728] sm:$0xff]  ;;  %v465_v15 = vld [vmem:[#allocation2 + $0x6d8] sm:$0xff]  ;;  %s3261_s19 = smul.u32 48, %s3880_s18  ;;  %s2660_s12 = sshll.u32 %s3880_s18, 8 }
  0x5e   : > { %2662 = vmatprep.subr.bf16.mxu0 %v2661_v4  ;;  %v2695_v13 = vpack.c.bf16 %v452_v11, %v440_v10  ;;  %v477_v16 = vld [vmem:[#allocation2 + $0x738] sm:$0xff]  ;;  %2694 = vmatprep.subr.bf16.mxu1 %v2693_v8  ;;  %v2665_v17 = vpack.c.bf16 %v475_v14, %v463_v12  ;;  %v462_v19 = vld [vmem:[#allocation2 + $0x6c0] sm:$0xff]  ;;  %v464_v21 = vld [vmem:[#allocation2 + $0x6d0] sm:$0xff]  ;;  %s3708_s14 = scalar_lea.vmem %s3868_s4, %s2660_s12 }
  0x5f   : > { %2664 = vmatpush1.bf16.msra.mxu0 %v2663_v9  ;;  %v2697_v18 = vpack.c.bf16 %v477_v16, %v465_v15  ;;  %v474_v20 = vld [vmem:[#allocation2 + $0x720] sm:$0xff]  ;;  %v476_v23 = vld [vmem:[#allocation2 + $0x730] sm:$0xff]  ;;  %v487_v24 = vld [vmem:[#allocation2 + $0x788] sm:$0xff]  ;;  %s3554_s30 = scalar_lea.vmem %s3864_s0, %s3261_s19 }
  0x60   : > { %2696 = vmatpush1.bf16.msra.mxu1 %v2695_v13  ;;  %v2667_v22 = vpack.c.bf16 %v474_v20, %v462_v19  ;;  %v499_v25 = vld [vmem:[#allocation2 + $0x7e8] sm:$0xff]  ;;  %2666 = vmatprep.subr.bf16.mxu0 %v2665_v17  ;;  %v2699_v26 = vpack.c.bf16 %v476_v23, %v464_v21  ;;  %v489_v28 = vld [vmem:[#allocation2 + $0x798] sm:$0xff]  ;;  %v486_v30 = vld [vmem:[#allocation2 + $0x780] sm:$0xff] }
  0x61   : > { %2698 = vmatprep.subr.bf16.mxu1 %v2697_v18  ;;  %v2669_v27 = vpack.c.bf16 %v499_v25, %v487_v24  ;;  %v501_v29 = vld [vmem:[#allocation2 + $0x7f8] sm:$0xff]  ;;  %v498_v32 = vld [vmem:[#allocation2 + $0x7e0] sm:$0xff]  ;;  %v488_v33 = vld [vmem:[#allocation2 + $0x790] sm:$0xff] }
  0x62   : > { %v2701_v31 = vpack.c.bf16 %v501_v29, %v489_v28  ;;  %v500_v34 = vld [vmem:[#allocation2 + $0x7f0] sm:$0xff]  ;;  %v2671_v35 = vpack.c.bf16 %v498_v32, %v486_v30  ;;  %v511_v36 = vld [vmem:[#allocation2 + $0x848] sm:$0xff]  ;;  %v513_v38 = vld [vmem:[#allocation2 + $0x858] sm:$0xff] }
  0x63   : > { %2668 = vmatpush1.bf16.msra.mxu0 %v2667_v22  ;;  %v523_v37 = vld [vmem:[#allocation2 + $0x8a8] sm:$0xff]  ;;  %v2703_v39 = vpack.c.bf16 %v500_v34, %v488_v33  ;;  %v525_v41 = vld [vmem:[#allocation2 + $0x8b8] sm:$0xff]  ;;  %v510_v42 = vld [vmem:[#allocation2 + $0x840] sm:$0xff] }
  0x64   : > { %2700 = vmatpush1.bf16.msra.mxu1 %v2699_v26  ;;  %2670 = vmatprep.subr.bf16.mxu0 %v2669_v27  ;;  %v2673_v40 = vpack.c.bf16 %v523_v37, %v511_v36  ;;  %v522_v43 = vld [vmem:[#allocation2 + $0x8a0] sm:$0xff]  ;;  %v2705_v44 = vpack.c.bf16 %v525_v41, %v513_v38  ;;  %v512_v45 = vld [vmem:[#allocation2 + $0x850] sm:$0xff]  ;;  %v535_v47 = vld [vmem:[#allocation2 + $0x908] sm:$0xff] }
  0x65   : > { %2702 = vmatprep.subr.bf16.mxu1 %v2701_v31  ;;  %v524_v46 = vld [vmem:[#allocation2 + $0x8b0] sm:$0xff]  ;;  %v547_v48 = vld [vmem:[#allocation2 + $0x968] sm:$0xff]  ;;  %v537_v49 = vld [vmem:[#allocation2 + $0x918] sm:$0xff]  ;;  %v2675_v51 = vpack.c.bf16 %v522_v43, %v510_v42 }
  0x66   : > { %v549_v50 = vld [vmem:[#allocation2 + $0x978] sm:$0xff]  ;;  %v2707_v52 = vpack.c.bf16 %v524_v46, %v512_v45  ;;  %v2677_v53 = vpack.c.bf16 %v547_v48, %v535_v47  ;;  %v534_v54 = vld [vmem:[#allocation2 + $0x900] sm:$0xff]  ;;  %v536_v56 = vld [vmem:[#allocation2 + $0x910] sm:$0xff] }
  0x67   : > { %2672 = vmatpush1.bf16.msra.mxu0 %v2671_v35  ;;  %v546_v55 = vld [vmem:[#allocation2 + $0x960] sm:$0xff]  ;;  %v2709_v57 = vpack.c.bf16 %v549_v50, %v537_v49  ;;  %v548_v58 = vld [vmem:[#allocation2 + $0x970] sm:$0xff]  ;;  %v559_v59 = vld [vmem:[#allocation2 + $0x9c8] sm:$0xff] }
  0x68   : > { %2704 = vmatpush1.bf16.msra.mxu1 %v2703_v39  ;;  %2674 = vmatprep.subr.bf16.mxu0 %v2673_v40  ;;  %v571_v60 = vld [vmem:[#allocation2 + $0xa28] sm:$0xff]  ;;  %v561_v61 = vld [vmem:[#allocation2 + $0x9d8] sm:$0xff]  ;;  %v2679_v63 = vpack.c.bf16 %v546_v55, %v534_v54  ;;  %v2711_v1 = vpack.c.bf16 %v548_v58, %v536_v56  ;;  %v558_v3 = vld [vmem:[#allocation2 + $0x9c0] sm:$0xff] }
  0x69   : > { %2706 = vmatprep.subr.bf16.mxu1 %v2705_v44  ;;  %v573_v62 = vld [vmem:[#allocation2 + $0xa38] sm:$0xff]  ;;  %v2681_v2 = vpack.c.bf16 %v571_v60, %v559_v59  ;;  %v570_v4 = vld [vmem:[#allocation2 + $0xa20] sm:$0xff]  ;;  %v560_v5 = vld [vmem:[#allocation2 + $0x9d0] sm:$0xff] }
  0x6a   : > { %v2713_v6 = vpack.c.bf16 %v573_v62, %v561_v61  ;;  %v572_v7 = vld [vmem:[#allocation2 + $0xa30] sm:$0xff]  ;;  %v583_v8 = vld [vmem:[#allocation2 + $0xa88] sm:$0xff]  ;;  %v585_v10 = vld [vmem:[#allocation2 + $0xa98] sm:$0xff]  ;;  %v2683_v12 = vpack.c.bf16 %v570_v4, %v558_v3 }
  0x6b   : > { %2676 = vmatpush1.bf16.msra.mxu0 %v2675_v51  ;;  %v595_v9 = vld [vmem:[#allocation2 + $0xae8] sm:$0xff]  ;;  %v597_v11 = vld [vmem:[#allocation2 + $0xaf8] sm:$0xff]  ;;  %v2715_v13 = vpack.c.bf16 %v572_v7, %v560_v5  ;;  %v582_v15 = vld [vmem:[#allocation2 + $0xa80] sm:$0xff] }
  0x6c   : > { %2708 = vmatpush1.bf16.msra.mxu1 %v2707_v52  ;;  %2678 = vmatprep.subr.bf16.mxu0 %v2677_v53  ;;  %v2685_v14 = vpack.c.bf16 %v595_v9, %v583_v8  ;;  %v594_v16 = vld [vmem:[#allocation2 + $0xae0] sm:$0xff]  ;;  %v584_v17 = vld [vmem:[#allocation2 + $0xa90] sm:$0xff]  ;;  %v2717_v18 = vpack.c.bf16 %v597_v11, %v585_v10  ;;  %v607_v20 = vld [vmem:[#allocation2 + $0xb48] sm:$0xff] }
  0x6d   : > { %2710 = vmatprep.subr.bf16.mxu1 %v2709_v57  ;;  %v596_v19 = vld [vmem:[#allocation2 + $0xaf0] sm:$0xff]  ;;  %v619_v21 = vld [vmem:[#allocation2 + $0xba8] sm:$0xff]  ;;  %v609_v22 = vld [vmem:[#allocation2 + $0xb58] sm:$0xff]  ;;  %v2687_v24 = vpack.c.bf16 %v594_v16, %v582_v15 }
  0x6e   : > { %v621_v23 = vld [vmem:[#allocation2 + $0xbb8] sm:$0xff]  ;;  %v2719_v25 = vpack.c.bf16 %v596_v19, %v584_v17  ;;  %v2689_v26 = vpack.c.bf16 %v619_v21, %v607_v20  ;;  %v606_v27 = vld [vmem:[#allocation2 + $0xb40] sm:$0xff]  ;;  %v608_v29 = vld [vmem:[#allocation2 + $0xb50] sm:$0xff] }
  0x6f   : > { %2680 = vmatpush1.bf16.msra.mxu0 %v2679_v63  ;;  %v618_v28 = vld [vmem:[#allocation2 + $0xba0] sm:$0xff]  ;;  %v2721_v30 = vpack.c.bf16 %v621_v23, %v609_v22  ;;  %v620_v31 = vld [vmem:[#allocation2 + $0xbb0] sm:$0xff]  ;;  %v443_v32 = vld [vmem:[#allocation2 + $0x628] sm:$0xff] }
  0x70   : > { %2712 = vmatpush1.bf16.msra.mxu1 %v2711_v1  ;;  %2682 = vmatprep.subr.bf16.mxu0 %v2681_v2  ;;  %v455_v33 = vld [vmem:[#allocation2 + $0x688] sm:$0xff]  ;;  %v445_v34 = vld [vmem:[#allocation2 + $0x638] sm:$0xff]  ;;  %v2691_v36 = vpack.c.bf16 %v618_v28, %v606_v27  ;;  %v2723_v37 = vpack.c.bf16 %v620_v31, %v608_v29  ;;  %v442_v39 = vld [vmem:[#allocation2 + $0x620] sm:$0xff] }
  0x71   : > { %2714 = vmatprep.subr.bf16.mxu1 %v2713_v6  ;;  %v457_v35 = vld [vmem:[#allocation2 + $0x698] sm:$0xff]  ;;  %v2725_v38 = vpack.c.bf16 %v455_v33, %v443_v32  ;;  %v454_v40 = vld [vmem:[#allocation2 + $0x680] sm:$0xff]  ;;  %v444_v42 = vld [vmem:[#allocation2 + $0x630] sm:$0xff] }
  0x72   : > { %v2757_v41 = vpack.c.bf16 %v457_v35, %v445_v34  ;;  %v456_v43 = vld [vmem:[#allocation2 + $0x690] sm:$0xff]  ;;  %v467_v44 = vld [vmem:[#allocation2 + $0x6e8] sm:$0xff]  ;;  %v2727_v47 = vpack.c.bf16 %v454_v40, %v442_v39  ;;  %v469_v48 = vld [vmem:[#allocation2 + $0x6f8] sm:$0xff] }
  0x73   : > { %2684 = vmatpush1.bf16.msra.mxu0 %v2683_v12  ;;  %v479_v45 = vld [vmem:[#allocation2 + $0x748] sm:$0xff]  ;;  %v3557_v46 = vld [vmem:[%s3554_s30 + $0x10] sm:$0xff]  ;;  %v481_v49 = vld [vmem:[#allocation2 + $0x758] sm:$0xff]  ;;  %v2759_v50 = vpack.c.bf16 %v456_v43, %v444_v42 }
  0x74   : > { %2716 = vmatpush1.bf16.msra.mxu1 %v2715_v13  ;;  %2686 = vmatprep.subr.bf16.mxu0 %v2685_v14  ;;  %v466_v51 = vld [vmem:[#allocation2 + $0x6e0] sm:$0xff]  ;;  %v468_v53 = vld [vmem:[#allocation2 + $0x6f0] sm:$0xff]  ;;  %v2729_v54 = vpack.c.bf16 %v479_v45, %v467_v44  ;;  %v491_v56 = vld [vmem:[#allocation2 + $0x7a8] sm:$0xff]  ;;  %v2761_v58 = vpack.c.bf16 %v481_v49, %v469_v48 }
  0x75   : > { %2718 = vmatprep.subr.bf16.mxu1 %v2717_v18  ;;  %v478_v52 = vld [vmem:[#allocation2 + $0x740] sm:$0xff]  ;;  %v480_v55 = vld [vmem:[#allocation2 + $0x750] sm:$0xff]  ;;  %v503_v57 = vld [vmem:[#allocation2 + $0x808] sm:$0xff] }
  0x76   : > { %v493_v59 = vld [vmem:[#allocation2 + $0x7b8] sm:$0xff]  ;;  %v2731_v62 = vpack.c.bf16 %v478_v52, %v466_v51  ;;  %v2763_v63 = vpack.c.bf16 %v480_v55, %v468_v53  ;;  %v2733_v1 = vpack.c.bf16 %v503_v57, %v491_v56  ;;  %v490_v2 = vld [vmem:[#allocation2 + $0x7a0] sm:$0xff]  ;;  %v492_v4 = vld [vmem:[#allocation2 + $0x7b0] sm:$0xff] }
  0x77   : > { %2688 = vmatpush1.bf16.msra.mxu0 %v2687_v24  ;;  %v505_v60 = vld [vmem:[#allocation2 + $0x818] sm:$0xff]  ;;  %v502_v3 = vld [vmem:[#allocation2 + $0x800] sm:$0xff]  ;;  %v504_v6 = vld [vmem:[#allocation2 + $0x810] sm:$0xff] }
  0x78   : > { %2720 = vmatpush1.bf16.msra.mxu1 %v2719_v25  ;;  %2690 = vmatprep.subr.bf16.mxu0 %v2689_v26  ;;  %v3562_v61 = vld [vmem:[%s3554_s30 + $0x18] sm:$0xff]  ;;  %v2765_v5 = vpack.c.bf16 %v505_v60, %v493_v59  ;;  %v515_v7 = vld [vmem:[#allocation2 + $0x868] sm:$0xff]  ;;  %v2735_v11 = vpack.c.bf16 %v502_v3, %v490_v2  ;;  %v2767_v12 = vpack.c.bf16 %v504_v6, %v492_v4  ;;  %v514_v14 = vld [vmem:[#allocation2 + $0x860] sm:$0xff] }
  0x79   : > { %2722 = vmatprep.subr.bf16.mxu1 %v2721_v30  ;;  %v527_v8 = vld [vmem:[#allocation2 + $0x8c8] sm:$0xff]  ;;  %v517_v9 = vld [vmem:[#allocation2 + $0x878] sm:$0xff]  ;;  %v526_v15 = vld [vmem:[#allocation2 + $0x8c0] sm:$0xff] }
  0x7a   : > { %v529_v10 = vld [vmem:[#allocation2 + $0x8d8] sm:$0xff]  ;;  %v2737_v13 = vpack.c.bf16 %v527_v8, %v515_v7  ;;  %v516_v16 = vld [vmem:[#allocation2 + $0x870] sm:$0xff]  ;;  %v539_v19 = vld [vmem:[#allocation2 + $0x928] sm:$0xff]  ;;  %v2739_v23 = vpack.c.bf16 %v526_v15, %v514_v14 }
  0x7b   : > { %2692 = vmatpush1.bf16.msra.mxu0 %v2691_v36  ;;  %v2769_v17 = vpack.c.bf16 %v529_v10, %v517_v9  ;;  %v528_v18 = vld [vmem:[#allocation2 + $0x8d0] sm:$0xff]  ;;  %v551_v20 = vld [vmem:[#allocation2 + $0x988] sm:$0xff]  ;;  %v541_v21 = vld [vmem:[#allocation2 + $0x938] sm:$0xff] }
  0x7c   : > { %2724 = vmatpush1.bf16.msra.mxu1 %v2723_v37  ;;  %2726 = vmatprep.subr.bf16.mxu0 %v2725_v38  ;;  %v553_v22 = vld [vmem:[#allocation2 + $0x998] sm:$0xff]  ;;  %v2771_v24 = vpack.c.bf16 %v528_v18, %v516_v16  ;;  %v2741_v25 = vpack.c.bf16 %v551_v20, %v539_v19  ;;  %v538_v26 = vld [vmem:[#allocation2 + $0x920] sm:$0xff]  ;;  %v540_v28 = vld [vmem:[#allocation2 + $0x930] sm:$0xff] }
  0x7d   : > { %2758 = vmatprep.subr.bf16.mxu1 %v2757_v41  ;;  %v550_v27 = vld [vmem:[#allocation2 + $0x980] sm:$0xff]  ;;  %v2773_v29 = vpack.c.bf16 %v553_v22, %v541_v21  ;;  %v552_v30 = vld [vmem:[#allocation2 + $0x990] sm:$0xff]  ;;  %v563_v31 = vld [vmem:[#allocation2 + $0x9e8] sm:$0xff] }
  0x7e   : > { %695 = vmatmul.mubr.f32.vlgmr.msra.gmra.mrb[0].mxu0 %v3557_v46  ;;  %v575_v32 = vld [vmem:[#allocation2 + $0xa48] sm:$0xff]  ;;  %v565_v33 = vld [vmem:[#allocation2 + $0x9f8] sm:$0xff]  ;;  %v2743_v35 = vpack.c.bf16 %v550_v27, %v538_v26  ;;  %v2775_v36 = vpack.c.bf16 %v552_v30, %v540_v28  ;;  %v562_v38 = vld [vmem:[#allocation2 + $0x9e0] sm:$0xff] }
  0x7f   : > { %772 = vmatmul.mubr.f32.vlgmr.msra.gmra.mrb[0].mxu1 %v3557_v46  ;;  %2728 = vmatpush1.bf16.msra.mxu0 %v2727_v47  ;;  %v577_v34 = vld [vmem:[#allocation2 + $0xa58] sm:$0xff]  ;;  %v2745_v37 = vpack.c.bf16 %v575_v32, %v563_v31  ;;  %v574_v39 = vld [vmem:[#allocation2 + $0xa40] sm:$0xff]  ;;  %v564_v40 = vld [vmem:[#allocation2 + $0x9f0] sm:$0xff] }
  0x80   : > { %2760 = vmatpush1.bf16.msra.mxu1 %v2759_v50  ;;  %700 = vmatprep.mubr.f32.mxu0 %v3409_v0  ;;  %v2777_v41 = vpack.c.bf16 %v577_v34, %v565_v33  ;;  %v576_v42 = vld [vmem:[#allocation2 + $0xa50] sm:$0xff]  ;;  %v587_v43 = vld [vmem:[#allocation2 + $0xaa8] sm:$0xff]  ;;  %v589_v45 = vld [vmem:[#allocation2 + $0xab8] sm:$0xff]  ;;  %v2747_v48 = vpack.c.bf16 %v574_v39, %v562_v38 }
  0x81   : > { %777 = vmatprep.mubr.f32.mxu1 %v3409_v0  ;;  %2730 = vmatprep.subr.bf16.mxu0 %v2729_v54  ;;  %v599_v44 = vld [vmem:[#allocation2 + $0xb08] sm:$0xff]  ;;  %v601_v47 = vld [vmem:[#allocation2 + $0xb18] sm:$0xff]  ;;  %v2779_v49 = vpack.c.bf16 %v576_v42, %v564_v40  ;;  %v586_v51 = vld [vmem:[#allocation2 + $0xaa0] sm:$0xff] }
  0x82   : > { %701 = vmatmul.mubr.f32.gmra.mrb[2].mxu0 %v3562_v61  ;;  %2762 = vmatprep.subr.bf16.mxu1 %v2761_v58  ;;  %v2749_v50 = vpack.c.bf16 %v599_v44, %v587_v43  ;;  %v598_v52 = vld [vmem:[#allocation2 + $0xb00] sm:$0xff]  ;;  %v588_v53 = vld [vmem:[#allocation2 + $0xab0] sm:$0xff]  ;;  %v2781_v54 = vpack.c.bf16 %v601_v47, %v589_v45  ;;  %v611_v56 = vld [vmem:[#allocation2 + $0xb68] sm:$0xff] }
  0x83   : > { %778 = vmatmul.mubr.f32.gmra.mrb[2].mxu1 %v3562_v61  ;;  %2732 = vmatpush1.bf16.msra.mxu0 %v2731_v62  ;;  %v600_v55 = vld [vmem:[#allocation2 + $0xb10] sm:$0xff]  ;;  %v623_v57 = vld [vmem:[#allocation2 + $0xbc8] sm:$0xff]  ;;  %v613_v58 = vld [vmem:[#allocation2 + $0xb78] sm:$0xff]  ;;  %v2751_v60 = vpack.c.bf16 %v598_v52, %v586_v51 }
  0x84   : > { %2764 = vmatpush1.bf16.msra.mxu1 %v2763_v63  ;;  %2734 = vmatprep.subr.bf16.mxu0 %v2733_v1  ;;  %v625_v59 = vld [vmem:[#allocation2 + $0xbd8] sm:$0xff]  ;;  %v2783_v62 = vpack.c.bf16 %v600_v55, %v588_v53  ;;  %v2753_v63 = vpack.c.bf16 %v623_v57, %v611_v56  ;;  %v610_v1 = vld [vmem:[#allocation2 + $0xb60] sm:$0xff]  ;;  %v612_v3 = vld [vmem:[#allocation2 + $0xb70] sm:$0xff] }
  0x85   : > { %2766 = vmatprep.subr.bf16.mxu1 %v2765_v5  ;;  %848 = vmatprep.mubr.f32.mxu0 %v3409_v0  ;;  %v622_v2 = vld [vmem:[#allocation2 + $0xbc0] sm:$0xff]  ;;  %v2785_v4 = vpack.c.bf16 %v625_v59, %v613_v58  ;;  %v624_v5 = vld [vmem:[#allocation2 + $0xbd0] sm:$0xff]  ;;  %v447_v6 = vld [vmem:[#allocation2 + $0x648] sm:$0xff] }
  0x86   : > { %925 = vmatprep.mubr.f32.mxu1 %v3409_v0  ;;  %v459_v7 = vld [vmem:[#allocation2 + $0x6a8] sm:$0xff]  ;;  %v449_v8 = vld [vmem:[#allocation2 + $0x658] sm:$0xff]  ;;  %v2755_v10 = vpack.c.bf16 %v622_v2, %v610_v1  ;;  %v458_v14 = vld [vmem:[#allocation2 + $0x6a0] sm:$0xff] }
  0x87   : > { %2736 = vmatpush1.bf16.msra.mxu0 %v2735_v11  ;;  %v461_v9 = vld [vmem:[#allocation2 + $0x6b8] sm:$0xff]  ;;  %v2787_v11 = vpack.c.bf16 %v624_v5, %v612_v3  ;;  %v448_v15 = vld [vmem:[#allocation2 + $0x650] sm:$0xff]  ;;  %v471_v18 = vld [vmem:[#allocation2 + $0x708] sm:$0xff] }
  0x88   : > { %2768 = vmatpush1.bf16.msra.mxu1 %v2767_v12  ;;  %2738 = vmatprep.subr.bf16.mxu0 %v2737_v13  ;;  %v2789_v12 = vpack.c.bf16 %v459_v7, %v447_v6  ;;  %v446_v13 = vld [vmem:[#allocation2 + $0x640] sm:$0xff]  ;;  %v2821_v16 = vpack.c.bf16 %v461_v9, %v449_v8  ;;  %v483_v19 = vld [vmem:[#allocation2 + $0x768] sm:$0xff]  ;;  %v473_v20 = vld [vmem:[#allocation2 + $0x718] sm:$0xff] }
  0x89   : > { %2770 = vmatprep.subr.bf16.mxu1 %v2769_v17  ;;  %v460_v17 = vld [vmem:[#allocation2 + $0x6b0] sm:$0xff]  ;;  %v485_v21 = vld [vmem:[#allocation2 + $0x778] sm:$0xff]  ;;  %v2791_v22 = vpack.c.bf16 %v458_v14, %v446_v13  ;;  %v482_v26 = vld [vmem:[#allocation2 + $0x760] sm:$0xff] }
  0x8a   : > { %v472_v27 = vld [vmem:[#allocation2 + $0x710] sm:$0xff]  ;;  %v2825_v28 = vpack.c.bf16 %v485_v21, %v473_v20  ;;  %v495_v30 = vld [vmem:[#allocation2 + $0x7c8] sm:$0xff]  ;;  %v497_v32 = vld [vmem:[#allocation2 + $0x7d8] sm:$0xff] }
  0x8b   : > { %2740 = vmatpush1.bf16.msra.mxu0 %v2739_v23  ;;  %v2823_v23 = vpack.c.bf16 %v460_v17, %v448_v15  ;;  %v507_v31 = vld [vmem:[#allocation2 + $0x828] sm:$0xff]  ;;  %v509_v33 = vld [vmem:[#allocation2 + $0x838] sm:$0xff]  ;;  %v506_v38 = vld [vmem:[#allocation2 + $0x820] sm:$0xff] }
  0x8c   : > { %2772 = vmatpush1.bf16.msra.mxu1 %v2771_v24  ;;  %2742 = vmatprep.subr.bf16.mxu0 %v2741_v25  ;;  %v2793_v24 = vpack.c.bf16 %v483_v19, %v471_v18  ;;  %v470_v25 = vld [vmem:[#allocation2 + $0x700] sm:$0xff]  ;;  %v496_v39 = vld [vmem:[#allocation2 + $0x7d0] sm:$0xff]  ;;  %v2829_v40 = vpack.c.bf16 %v509_v33, %v497_v32  ;;  %v519_v42 = vld [vmem:[#allocation2 + $0x888] sm:$0xff] }
  0x8d   : > { %2774 = vmatprep.subr.bf16.mxu1 %v2773_v29  ;;  %v484_v29 = vld [vmem:[#allocation2 + $0x770] sm:$0xff]  ;;  %v2795_v34 = vpack.c.bf16 %v482_v26, %v470_v25  ;;  %v531_v43 = vld [vmem:[#allocation2 + $0x8e8] sm:$0xff]  ;;  %v521_v44 = vld [vmem:[#allocation2 + $0x898] sm:$0xff] }
  0x8e   : > { %v533_v45 = vld [vmem:[#allocation2 + $0x8f8] sm:$0xff]  ;;  %v530_v51 = vld [vmem:[#allocation2 + $0x8e0] sm:$0xff]  ;;  %v520_v52 = vld [vmem:[#allocation2 + $0x890] sm:$0xff] }
  0x8f   : > { %2744 = vmatpush1.bf16.msra.mxu0 %v2743_v35  ;;  %v2827_v35 = vpack.c.bf16 %v484_v29, %v472_v27  ;;  %v2833_v53 = vpack.c.bf16 %v533_v45, %v521_v44  ;;  %v543_v55 = vld [vmem:[#allocation2 + $0x948] sm:$0xff]  ;;  %v545_v57 = vld [vmem:[#allocation2 + $0x958] sm:$0xff]  ;;  %v554_v1 = vld [vmem:[#allocation2 + $0x9a0] sm:$0xff] }
  0x90   : > { %2776 = vmatpush1.bf16.msra.mxu1 %v2775_v36  ;;  %2746 = vmatprep.subr.bf16.mxu0 %v2745_v37  ;;  %v2797_v36 = vpack.c.bf16 %v507_v31, %v495_v30  ;;  %v494_v37 = vld [vmem:[#allocation2 + $0x7c0] sm:$0xff]  ;;  %v555_v56 = vld [vmem:[#allocation2 + $0x9a8] sm:$0xff]  ;;  %v557_v58 = vld [vmem:[#allocation2 + $0x9b8] sm:$0xff] }
  0x91   : > { %2778 = vmatprep.subr.bf16.mxu1 %v2777_v41  ;;  %v508_v41 = vld [vmem:[#allocation2 + $0x830] sm:$0xff]  ;;  %v2799_v47 = vpack.c.bf16 %v506_v38, %v494_v37  ;;  %v2837_v3 = vpack.c.bf16 %v557_v58, %v545_v57  ;;  %v567_v5 = vld [vmem:[#allocation2 + $0xa08] sm:$0xff]  ;;  %v569_v7 = vld [vmem:[#allocation2 + $0xa18] sm:$0xff] }
  0x92   : > { %v544_v2 = vld [vmem:[#allocation2 + $0x950] sm:$0xff]  ;;  %v579_v6 = vld [vmem:[#allocation2 + $0xa68] sm:$0xff]  ;;  %v581_v8 = vld [vmem:[#allocation2 + $0xa78] sm:$0xff] }
  0x93   : > { %2748 = vmatpush1.bf16.msra.mxu0 %v2747_v48  ;;  %v2831_v48 = vpack.c.bf16 %v508_v41, %v496_v39  ;;  %v578_v13 = vld [vmem:[#allocation2 + $0xa60] sm:$0xff]  ;;  %v568_v14 = vld [vmem:[#allocation2 + $0xa10] sm:$0xff]  ;;  %v2841_v15 = vpack.c.bf16 %v581_v8, %v569_v7  ;;  %v591_v17 = vld [vmem:[#allocation2 + $0xac8] sm:$0xff] }
  0x94   : > { %2780 = vmatpush1.bf16.msra.mxu1 %v2779_v49  ;;  %2750 = vmatprep.subr.bf16.mxu0 %v2749_v50  ;;  %v2801_v49 = vpack.c.bf16 %v531_v43, %v519_v42  ;;  %v518_v50 = vld [vmem:[#allocation2 + $0x880] sm:$0xff]  ;;  %v603_v18 = vld [vmem:[#allocation2 + $0xb28] sm:$0xff]  ;;  %v593_v19 = vld [vmem:[#allocation2 + $0xad8] sm:$0xff] }
  0x95   : > { %2782 = vmatprep.subr.bf16.mxu1 %v2781_v54  ;;  %v532_v54 = vld [vmem:[#allocation2 + $0x8f0] sm:$0xff]  ;;  %v2803_v59 = vpack.c.bf16 %v530_v51, %v518_v50  ;;  %v605_v20 = vld [vmem:[#allocation2 + $0xb38] sm:$0xff]  ;;  %v602_v25 = vld [vmem:[#allocation2 + $0xb20] sm:$0xff] }
  0x96   : > { %v592_v26 = vld [vmem:[#allocation2 + $0xad0] sm:$0xff]  ;;  %v2845_v27 = vpack.c.bf16 %v605_v20, %v593_v19  ;;  %v615_v29 = vld [vmem:[#allocation2 + $0xb88] sm:$0xff]  ;;  %v617_v31 = vld [vmem:[#allocation2 + $0xb98] sm:$0xff] }
  0x97   : > { %2752 = vmatpush1.bf16.msra.mxu0 %v2751_v60  ;;  %v2835_v60 = vpack.c.bf16 %v532_v54, %v520_v52  ;;  %v627_v30 = vld [vmem:[#allocation2 + $0xbe8] sm:$0xff]  ;;  %v629_v32 = vld [vmem:[#allocation2 + $0xbf8] sm:$0xff]  ;;  %v626_v37 = vld [vmem:[#allocation2 + $0xbe0] sm:$0xff] }
  0x98   : > { %2784 = vmatpush1.bf16.msra.mxu1 %v2783_v62  ;;  %2754 = vmatprep.subr.bf16.mxu0 %v2753_v63  ;;  %v2805_v62 = vpack.c.bf16 %v555_v56, %v543_v55  ;;  %v542_v63 = vld [vmem:[#allocation2 + $0x940] sm:$0xff]  ;;  %v616_v38 = vld [vmem:[#allocation2 + $0xb90] sm:$0xff]  ;;  %v2849_v39 = vpack.c.bf16 %v629_v32, %v617_v31  ;;  %v1097_v41 = vld [vmem:[#allocation2 + $0xc08] sm:$0xff] }
  0x99   : > { %2786 = vmatprep.subr.bf16.mxu1 %v2785_v4  ;;  %v556_v4 = vld [vmem:[#allocation2 + $0x9b0] sm:$0xff]  ;;  %v2807_v9 = vpack.c.bf16 %v554_v1, %v542_v63  ;;  %v1109_v42 = vld [vmem:[#allocation2 + $0xc68] sm:$0xff]  ;;  %v1099_v43 = vld [vmem:[#allocation2 + $0xc18] sm:$0xff] }
  0x9a   : > { %v1111_v44 = vld [vmem:[#allocation2 + $0xc78] sm:$0xff]  ;;  %v1108_v50 = vld [vmem:[#allocation2 + $0xc60] sm:$0xff]  ;;  %v1098_v52 = vld [vmem:[#allocation2 + $0xc10] sm:$0xff] }
  0x9b   : > { %2756 = vmatpush1.bf16.msra.mxu0 %v2755_v10  ;;  %v2839_v10 = vpack.c.bf16 %v556_v4, %v544_v2  ;;  %v2885_v51 = vpack.c.bf16 %v1111_v44, %v1099_v43  ;;  %v1121_v54 = vld [vmem:[#allocation2 + $0xcc8] sm:$0xff]  ;;  %v1123_v57 = vld [vmem:[#allocation2 + $0xcd8] sm:$0xff]  ;;  %v1122_v63 = vld [vmem:[#allocation2 + $0xcd0] sm:$0xff] }
  0x9c   : > { %2788 = vmatpush1.bf16.msra.mxu1 %v2787_v11  ;;  %2790 = vmatprep.subr.bf16.mxu0 %v2789_v12  ;;  %v2809_v11 = vpack.c.bf16 %v579_v6, %v567_v5  ;;  %v566_v12 = vld [vmem:[#allocation2 + $0xa00] sm:$0xff]  ;;  %v1133_v55 = vld [vmem:[#allocation2 + $0xd28] sm:$0xff]  ;;  %v1135_v58 = vld [vmem:[#allocation2 + $0xd38] sm:$0xff] }
  0x9d   : > { %2822 = vmatprep.subr.bf16.mxu1 %v2821_v16  ;;  %v580_v16 = vld [vmem:[#allocation2 + $0xa70] sm:$0xff]  ;;  %v2811_v21 = vpack.c.bf16 %v578_v13, %v566_v12  ;;  %v2857_v1 = vpack.c.bf16 %v1133_v55, %v1121_v54  ;;  %v1157_v4 = vld [vmem:[#allocation2 + $0xde8] sm:$0xff]  ;;  %v2889_v5 = vpack.c.bf16 %v1135_v58, %v1123_v57  ;;  %v1147_v6 = vld [vmem:[#allocation2 + $0xd98] sm:$0xff] }
  0x9e   : > { %849 = vmatmul.mubr.f32.vlgmr.msra.gmra.mrb[4].mxu0 %v3557_v46  ;;  %v1134_v2 = vld [vmem:[#allocation2 + $0xd30] sm:$0xff]  ;;  %v1159_v7 = vld [vmem:[#allocation2 + $0xdf8] sm:$0xff]  ;;  %v1156_v12 = vld [vmem:[#allocation2 + $0xde0] sm:$0xff] }
  0x9f   : > { %926 = vmatmul.mubr.f32.vlgmr.msra.gmra.mrb[4].mxu1 %v3557_v46  ;;  %2792 = vmatpush1.bf16.msra.mxu0 %v2791_v22  ;;  %v2843_v22 = vpack.c.bf16 %v580_v16, %v568_v14  ;;  %v1146_v13 = vld [vmem:[#allocation2 + $0xd90] sm:$0xff]  ;;  %v2893_v14 = vpack.c.bf16 %v1159_v7, %v1147_v6  ;;  %v1169_v16 = vld [vmem:[#allocation2 + $0xe48] sm:$0xff]  ;;  %v1255_v54 = vld [vmem:[#allocation2 + $0x10f8] sm:$0xff] }
  0xa0   : > { %2824 = vmatpush1.bf16.msra.mxu1 %v2823_v23  ;;  %2794 = vmatprep.subr.bf16.mxu0 %v2793_v24  ;;  %v2813_v23 = vpack.c.bf16 %v603_v18, %v591_v17  ;;  %v590_v24 = vld [vmem:[#allocation2 + $0xac0] sm:$0xff]  ;;  %v1181_v17 = vld [vmem:[#allocation2 + $0xea8] sm:$0xff]  ;;  %v1183_v18 = vld [vmem:[#allocation2 + $0xeb8] sm:$0xff] }
  0xa1   : > { %2826 = vmatprep.subr.bf16.mxu1 %v2825_v28  ;;  %854 = vmatprep.mubr.f32.mxu0 %v3409_v0  ;;  %v604_v28 = vld [vmem:[#allocation2 + $0xb30] sm:$0xff]  ;;  %v2815_v33 = vpack.c.bf16 %v602_v25, %v590_v24  ;;  %v1240_v58 = vld [vmem:[#allocation2 + $0x1080] sm:$0xff] }
  0xa2   : > { %931 = vmatprep.mubr.f32.mxu1 %v3409_v0  ;;  %855 = vmatmul.mubr.f32.gmra.mrb[6].mxu0 %v3562_v61  ;;  %v1170_v24 = vld [vmem:[#allocation2 + $0xe50] sm:$0xff] }
  0xa3   : > { %2796 = vmatpush1.bf16.msra.mxu0 %v2795_v34  ;;  %932 = vmatmul.mubr.f32.gmra.mrb[6].mxu1 %v3562_v61  ;;  %v2847_v34 = vpack.c.bf16 %v604_v28, %v592_v26  ;;  %v1182_v26 = vld [vmem:[#allocation2 + $0xeb0] sm:$0xff]  ;;  %v1205_v28 = vld [vmem:[#allocation2 + $0xf68] sm:$0xff] }
  0xa4   : > { %2828 = vmatpush1.bf16.msra.mxu1 %v2827_v35  ;;  %2798 = vmatprep.subr.bf16.mxu0 %v2797_v36  ;;  %v2817_v35 = vpack.c.bf16 %v627_v30, %v615_v29  ;;  %v614_v36 = vld [vmem:[#allocation2 + $0xb80] sm:$0xff]  ;;  %v1195_v29 = vld [vmem:[#allocation2 + $0xf18] sm:$0xff]  ;;  %v2899_v31 = vpack.c.bf16 %v1182_v26, %v1170_v24  ;;  %v1125_v24 = vld [vmem:[#allocation2 + $0xce8] sm:$0xff] }
  0xa5   : > { %2830 = vmatprep.subr.bf16.mxu1 %v2829_v40  ;;  %1002 = vmatprep.mubr.f32.mxu0 %v3409_v0  ;;  %v628_v40 = vld [vmem:[#allocation2 + $0xbf0] sm:$0xff]  ;;  %v2819_v45 = vpack.c.bf16 %v626_v37, %v614_v36  ;;  %v1207_v30 = vld [vmem:[#allocation2 + $0xf78] sm:$0xff] }
  0xa6   : > { %1079 = vmatprep.mubr.f32.mxu1 %v3409_v0  ;;  %v2901_v36 = vpack.c.bf16 %v1207_v30, %v1195_v29  ;;  %v1206_v37 = vld [vmem:[#allocation2 + $0xf70] sm:$0xff]  ;;  %v1127_v26 = vld [vmem:[#allocation2 + $0xcf8] sm:$0xff] }
  0xa7   : > { %2800 = vmatpush1.bf16.msra.mxu0 %v2799_v47  ;;  %v2851_v47 = vpack.c.bf16 %v628_v40, %v616_v38  ;;  %v1217_v38 = vld [vmem:[#allocation2 + $0xfc8] sm:$0xff]  ;;  %v1219_v40 = vld [vmem:[#allocation2 + $0xfd8] sm:$0xff] }
  0xa8   : > { %2832 = vmatpush1.bf16.msra.mxu1 %v2831_v48  ;;  %2802 = vmatprep.subr.bf16.mxu0 %v2801_v49  ;;  %v2853_v48 = vpack.c.bf16 %v1109_v42, %v1097_v41  ;;  %v1096_v49 = vld [vmem:[#allocation2 + $0xc00] sm:$0xff]  ;;  %v1231_v41 = vld [vmem:[#allocation2 + $0x1038] sm:$0xff] }
  0xa9   : > { %2834 = vmatprep.subr.bf16.mxu1 %v2833_v53  ;;  %v1110_v53 = vld [vmem:[#allocation2 + $0xc70] sm:$0xff]  ;;  %v2855_v56 = vpack.c.bf16 %v1108_v50, %v1096_v49  ;;  %v2905_v49 = vpack.c.bf16 %v1231_v41, %v1219_v40  ;;  %v3592_v41 = vld [vmem:[%s3554_s30 + $0x28] sm:$0xff] }
  0xaa   : > { %v1230_v50 = vld [vmem:[#allocation2 + $0x1030] sm:$0xff] }
  0xab   : > { %2804 = vmatpush1.bf16.msra.mxu0 %v2803_v59  ;;  %v2887_v59 = vpack.c.bf16 %v1110_v53, %v1098_v52  ;;  %v1253_v52 = vld [vmem:[#allocation2 + $0x10e8] sm:$0xff]  ;;  %v1243_v53 = vld [vmem:[#allocation2 + $0x1098] sm:$0xff] }
  0xac   : > { %2836 = vmatpush1.bf16.msra.mxu1 %v2835_v60  ;;  %2806 = vmatprep.subr.bf16.mxu0 %v2805_v62  ;;  %v1120_v60 = vld [vmem:[#allocation2 + $0xcc0] sm:$0xff] }
  0xad   : > { %2838 = vmatprep.subr.bf16.mxu1 %v2837_v3  ;;  %v1132_v62 = vld [vmem:[#allocation2 + $0xd20] sm:$0xff]  ;;  %v1145_v3 = vld [vmem:[#allocation2 + $0xd88] sm:$0xff] }
  0xae   : > { %v2859_v8 = vpack.c.bf16 %v1132_v62, %v1120_v60  ;;  %v1242_v60 = vld [vmem:[#allocation2 + $0x1090] sm:$0xff]  ;;  %v2909_v62 = vpack.c.bf16 %v1255_v54, %v1243_v53  ;;  %v1187_v53 = vld [vmem:[#allocation2 + $0xed8] sm:$0xff] }
  0xaf   : > { %2808 = vmatpush1.bf16.msra.mxu0 %v2807_v9  ;;  %v2891_v9 = vpack.c.bf16 %v1134_v2, %v1122_v63  ;;  %v1254_v63 = vld [vmem:[#allocation2 + $0x10f0] sm:$0xff]  ;;  %v1277_v2 = vld [vmem:[#allocation2 + $0x11a8] sm:$0xff] }
  0xb0   : > { %2840 = vmatpush1.bf16.msra.mxu1 %v2839_v10  ;;  %2810 = vmatprep.subr.bf16.mxu0 %v2809_v11  ;;  %v2861_v10 = vpack.c.bf16 %v1157_v4, %v1145_v3  ;;  %v1144_v11 = vld [vmem:[#allocation2 + $0xd80] sm:$0xff]  ;;  %v1267_v3 = vld [vmem:[#allocation2 + $0x1158] sm:$0xff]  ;;  %v2911_v6 = vpack.c.bf16 %v1254_v63, %v1242_v60  ;;  %v1197_v63 = vld [vmem:[#allocation2 + $0xf28] sm:$0xff] }
  0xb1   : > { %2842 = vmatprep.subr.bf16.mxu1 %v2841_v15  ;;  %v1158_v15 = vld [vmem:[#allocation2 + $0xdf0] sm:$0xff]  ;;  %v2863_v19 = vpack.c.bf16 %v1156_v12, %v1144_v11  ;;  %v1279_v4 = vld [vmem:[#allocation2 + $0x11b8] sm:$0xff] }
  0xb2   : > { %v2895_v20 = vpack.c.bf16 %v1158_v15, %v1146_v13  ;;  %v2913_v11 = vpack.c.bf16 %v1279_v4, %v1267_v3  ;;  %v1278_v12 = vld [vmem:[#allocation2 + $0x11b0] sm:$0xff]  ;;  %v1101_v13 = vld [vmem:[#allocation2 + $0xc28] sm:$0xff]  ;;  %v1103_v15 = vld [vmem:[#allocation2 + $0xc38] sm:$0xff] }
  0xb3   : > { %2812 = vmatpush1.bf16.msra.mxu0 %v2811_v21  ;;  %v2865_v21 = vpack.c.bf16 %v1181_v17, %v1169_v16  ;;  %v1115_v16 = vld [vmem:[#allocation2 + $0xc98] sm:$0xff] }
  0xb4   : > { %2844 = vmatpush1.bf16.msra.mxu1 %v2843_v22  ;;  %2814 = vmatprep.subr.bf16.mxu0 %v2813_v23  ;;  %v1168_v22 = vld [vmem:[#allocation2 + $0xe40] sm:$0xff]  ;;  %v1211_v3 = vld [vmem:[#allocation2 + $0xf98] sm:$0xff] }
  0xb5   : > { %2846 = vmatprep.subr.bf16.mxu1 %v2845_v27  ;;  %v1180_v23 = vld [vmem:[#allocation2 + $0xea0] sm:$0xff]  ;;  %v1193_v27 = vld [vmem:[#allocation2 + $0xf08] sm:$0xff] }
  0xb6   : > { %v2869_v32 = vpack.c.bf16 %v1205_v28, %v1193_v27  ;;  %v1139_v27 = vld [vmem:[#allocation2 + $0xd58] sm:$0xff]  ;;  %v3587_v28 = vld [vmem:[%s3554_s30 + $0x20] sm:$0xff] }
  0xb7   : > { %2816 = vmatpush1.bf16.msra.mxu0 %v2815_v33  ;;  %v1192_v33 = vld [vmem:[#allocation2 + $0xf00] sm:$0xff] }
  0xb8   : > { %2848 = vmatpush1.bf16.msra.mxu1 %v2847_v34  ;;  %2818 = vmatprep.subr.bf16.mxu0 %v2817_v35  ;;  %v1204_v34 = vld [vmem:[#allocation2 + $0xf60] sm:$0xff]  ;;  %v1194_v35 = vld [vmem:[#allocation2 + $0xf10] sm:$0xff] }
  0xb9   : > { %2850 = vmatprep.subr.bf16.mxu1 %v2849_v39  ;;  %v1229_v39 = vld [vmem:[#allocation2 + $0x1028] sm:$0xff]  ;;  %v2871_v42 = vpack.c.bf16 %v1204_v34, %v1192_v33  ;;  %v2903_v43 = vpack.c.bf16 %v1206_v37, %v1194_v35  ;;  %v1126_v33 = vld [vmem:[#allocation2 + $0xcf0] sm:$0xff]  ;;  %v2953_v34 = vpack.c.bf16 %v1139_v27, %v1127_v26  ;;  %v1259_v26 = vld [vmem:[#allocation2 + $0x1118] sm:$0xff] }
  0xba   : > { %v2873_v44 = vpack.c.bf16 %v1229_v39, %v1217_v38  ;;  %v1138_v35 = vld [vmem:[#allocation2 + $0xd50] sm:$0xff]  ;;  %v1161_v37 = vld [vmem:[#allocation2 + $0xe08] sm:$0xff]  ;;  %v1151_v38 = vld [vmem:[#allocation2 + $0xdb8] sm:$0xff] }
  0xbb   : > { %2820 = vmatpush1.bf16.msra.mxu0 %v2819_v45  ;;  %v1216_v45 = vld [vmem:[#allocation2 + $0xfc0] sm:$0xff]  ;;  %v1163_v39 = vld [vmem:[#allocation2 + $0xe18] sm:$0xff] }
  0xbc   : > { %2852 = vmatpush1.bf16.msra.mxu1 %v2851_v47  ;;  %2854 = vmatprep.subr.bf16.mxu0 %v2853_v48  ;;  %v1228_v47 = vld [vmem:[#allocation2 + $0x1020] sm:$0xff]  ;;  %v1218_v48 = vld [vmem:[#allocation2 + $0xfd0] sm:$0xff] }
  0xbd   : > { %2886 = vmatprep.subr.bf16.mxu1 %v2885_v51  ;;  %v1241_v51 = vld [vmem:[#allocation2 + $0x1088] sm:$0xff]  ;;  %v2875_v55 = vpack.c.bf16 %v1228_v47, %v1216_v45  ;;  %v1160_v45 = vld [vmem:[#allocation2 + $0xe00] sm:$0xff]  ;;  %v1150_v47 = vld [vmem:[#allocation2 + $0xdb0] sm:$0xff] }
  0xbe   : > { %1003 = vmatmul.mubr.f32.vlgmr.msra.gmra.mrb[8].mxu0 %v3557_v46  ;;  %v2877_v57 = vpack.c.bf16 %v1253_v52, %v1241_v51  ;;  %v1185_v51 = vld [vmem:[#allocation2 + $0xec8] sm:$0xff]  ;;  %v1175_v52 = vld [vmem:[#allocation2 + $0xe78] sm:$0xff] }
  0xbf   : > { %1080 = vmatmul.mubr.f32.vlgmr.msra.gmra.mrb[8].mxu1 %v3557_v46  ;;  %2856 = vmatpush1.bf16.msra.mxu0 %v2855_v56  ;;  %v1171_v46 = vld [vmem:[#allocation2 + $0xe58] sm:$0xff]  ;;  %v2907_v56 = vpack.c.bf16 %v1230_v50, %v1218_v48  ;;  %v2957_v48 = vpack.c.bf16 %v1163_v39, %v1151_v38  ;;  %v1173_v50 = vld [vmem:[#allocation2 + $0xe68] sm:$0xff]  ;;  %v2961_v60 = vpack.c.bf16 %v1187_v53, %v1175_v52 }
  0xc0   : > { %2888 = vmatpush1.bf16.msra.mxu1 %v2887_v59  ;;  %1008 = vmatprep.mubr.f32.mxu0 %v3409_v0  ;;  %v2897_v25 = vpack.c.bf16 %v1183_v18, %v1171_v46  ;;  %v1252_v59 = vld [vmem:[#allocation2 + $0x10e0] sm:$0xff]  ;;  %v1283_v38 = vld [vmem:[#allocation2 + $0x11d8] sm:$0xff] }
  0xc1   : > { %1085 = vmatprep.mubr.f32.mxu1 %v3409_v0  ;;  %2858 = vmatprep.subr.bf16.mxu0 %v2857_v1  ;;  %v1265_v1 = vld [vmem:[#allocation2 + $0x1148] sm:$0xff]  ;;  %v1119_v52 = vld [vmem:[#allocation2 + $0xcb8] sm:$0xff] }
  0xc2   : > { %1009 = vmatmul.mubr.f32.gmra.mrb[10].mxu0 %v3562_v61  ;;  %2890 = vmatprep.subr.bf16.mxu1 %v2889_v5  ;;  %v2879_v5 = vpack.c.bf16 %v1252_v59, %v1240_v58  ;;  %v2881_v7 = vpack.c.bf16 %v1277_v2, %v1265_v1  ;;  %v1184_v58 = vld [vmem:[#allocation2 + $0xec0] sm:$0xff]  ;;  %v1174_v59 = vld [vmem:[#allocation2 + $0xe70] sm:$0xff]  ;;  %v1209_v1 = vld [vmem:[#allocation2 + $0xf88] sm:$0xff] }
  0xc3   : > { %1086 = vmatmul.mubr.f32.gmra.mrb[10].mxu1 %v3562_v61  ;;  %2860 = vmatpush1.bf16.msra.mxu0 %v2859_v8  ;;  %v2867_v61 = vpack.c.bf16 %v1180_v23, %v1168_v22  ;;  %v1264_v8 = vld [vmem:[#allocation2 + $0x1140] sm:$0xff]  ;;  %v2949_v22 = vpack.c.bf16 %v1115_v16, %v1103_v15  ;;  %v1114_v23 = vld [vmem:[#allocation2 + $0xc90] sm:$0xff]  ;;  %v1199_v2 = vld [vmem:[#allocation2 + $0xf38] sm:$0xff] }
  0xc4   : > { %2892 = vmatpush1.bf16.msra.mxu1 %v2891_v9  ;;  %2862 = vmatprep.subr.bf16.mxu0 %v2861_v10  ;;  %v1276_v9 = vld [vmem:[#allocation2 + $0x11a0] sm:$0xff]  ;;  %v1266_v10 = vld [vmem:[#allocation2 + $0x1150] sm:$0xff]  ;;  %v1235_v15 = vld [vmem:[#allocation2 + $0x1058] sm:$0xff] }
  0xc5   : > { %2894 = vmatprep.subr.bf16.mxu1 %v2893_v14  ;;  %1352 = vmatprep.mubr.f32.mxu0 %v3409_v0  ;;  %v1113_v14 = vld [vmem:[#allocation2 + $0xc88] sm:$0xff]  ;;  %v2883_v17 = vpack.c.bf16 %v1276_v9, %v1264_v8  ;;  %v2915_v46 = vpack.c.bf16 %v1278_v12, %v1266_v10  ;;  %v1208_v8 = vld [vmem:[#allocation2 + $0xf80] sm:$0xff]  ;;  %v1198_v9 = vld [vmem:[#allocation2 + $0xf30] sm:$0xff]  ;;  %v2965_v10 = vpack.c.bf16 %v1211_v3, %v1199_v2 }
  0xc6   : > { %1429 = vmatprep.mubr.f32.mxu1 %v3409_v0  ;;  %v2917_v18 = vpack.c.bf16 %v1113_v14, %v1101_v13  ;;  %v1221_v12 = vld [vmem:[#allocation2 + $0xfe8] sm:$0xff]  ;;  %v1223_v14 = vld [vmem:[#allocation2 + $0xff8] sm:$0xff] }
  0xc7   : > { %2864 = vmatpush1.bf16.msra.mxu0 %v2863_v19  ;;  %v1100_v19 = vld [vmem:[#allocation2 + $0xc20] sm:$0xff]  ;;  %v1233_v13 = vld [vmem:[#allocation2 + $0x1048] sm:$0xff]  ;;  %v1143_v2 = vld [vmem:[#allocation2 + $0xd78] sm:$0xff] }
  0xc8   : > { %2896 = vmatpush1.bf16.msra.mxu1 %v2895_v20  ;;  %2866 = vmatprep.subr.bf16.mxu0 %v2865_v21  ;;  %v1112_v20 = vld [vmem:[#allocation2 + $0xc80] sm:$0xff]  ;;  %v1102_v21 = vld [vmem:[#allocation2 + $0xc30] sm:$0xff] }
  0xc9   : > { %2898 = vmatprep.subr.bf16.mxu1 %v2897_v25  ;;  %v1137_v25 = vld [vmem:[#allocation2 + $0xd48] sm:$0xff]  ;;  %v2919_v29 = vpack.c.bf16 %v1112_v20, %v1100_v19  ;;  %v2951_v30 = vpack.c.bf16 %v1114_v23, %v1102_v21  ;;  %v1232_v19 = vld [vmem:[#allocation2 + $0x1040] sm:$0xff]  ;;  %v1222_v20 = vld [vmem:[#allocation2 + $0xff0] sm:$0xff]  ;;  %v2969_v21 = vpack.c.bf16 %v1235_v15, %v1223_v14 }
  0xca   : > { %v1245_v23 = vld [vmem:[#allocation2 + $0x10a8] sm:$0xff]  ;;  %v1167_v14 = vld [vmem:[#allocation2 + $0xe38] sm:$0xff] }
  0xcb   : > { %2868 = vmatpush1.bf16.msra.mxu0 %v2867_v61  ;;  %v2921_v61 = vpack.c.bf16 %v1137_v25, %v1125_v24  ;;  %v1257_v24 = vld [vmem:[#allocation2 + $0x1108] sm:$0xff]  ;;  %v1247_v25 = vld [vmem:[#allocation2 + $0x10b8] sm:$0xff] }
  0xcc   : > { %2900 = vmatpush1.bf16.msra.mxu1 %v2899_v31  ;;  %2870 = vmatprep.subr.bf16.mxu0 %v2869_v32  ;;  %v1124_v31 = vld [vmem:[#allocation2 + $0xce0] sm:$0xff] }
  0xcd   : > { %2902 = vmatprep.subr.bf16.mxu1 %v2901_v36  ;;  %v1136_v32 = vld [vmem:[#allocation2 + $0xd40] sm:$0xff]  ;;  %v1149_v36 = vld [vmem:[#allocation2 + $0xda8] sm:$0xff] }
  0xce   : > { %v2923_v40 = vpack.c.bf16 %v1136_v32, %v1124_v31  ;;  %v1256_v31 = vld [vmem:[#allocation2 + $0x1100] sm:$0xff]  ;;  %v1246_v32 = vld [vmem:[#allocation2 + $0x10b0] sm:$0xff] }
  0xcf   : > { %2872 = vmatpush1.bf16.msra.mxu0 %v2871_v42  ;;  %v2955_v42 = vpack.c.bf16 %v1138_v35, %v1126_v33  ;;  %v2973_v33 = vpack.c.bf16 %v1259_v26, %v1247_v25  ;;  %v1269_v35 = vld [vmem:[#allocation2 + $0x1168] sm:$0xff]  ;;  %v1191_v25 = vld [vmem:[#allocation2 + $0xef8] sm:$0xff] }
  0xd0   : > { %2904 = vmatpush1.bf16.msra.mxu1 %v2903_v43  ;;  %2874 = vmatprep.subr.bf16.mxu0 %v2873_v44  ;;  %v2925_v43 = vpack.c.bf16 %v1161_v37, %v1149_v36  ;;  %v1148_v44 = vld [vmem:[#allocation2 + $0xda0] sm:$0xff]  ;;  %v1281_v36 = vld [vmem:[#allocation2 + $0x11c8] sm:$0xff]  ;;  %v1271_v37 = vld [vmem:[#allocation2 + $0x1178] sm:$0xff] }
  0xd1   : > { %2906 = vmatprep.subr.bf16.mxu1 %v2905_v49  ;;  %v1162_v49 = vld [vmem:[#allocation2 + $0xe10] sm:$0xff]  ;;  %v2927_v54 = vpack.c.bf16 %v1160_v45, %v1148_v44  ;;  %v1280_v44 = vld [vmem:[#allocation2 + $0x11c0] sm:$0xff] }
  0xd2   : > { %v1270_v45 = vld [vmem:[#allocation2 + $0x1170] sm:$0xff] }
  0xd3   : > { %2876 = vmatpush1.bf16.msra.mxu0 %v2875_v55  ;;  %v2959_v55 = vpack.c.bf16 %v1162_v49, %v1150_v47  ;;  %v2977_v47 = vpack.c.bf16 %v1283_v38, %v1271_v37  ;;  %v1105_v49 = vld [vmem:[#allocation2 + $0xc48] sm:$0xff]  ;;  %v1215_v37 = vld [vmem:[#allocation2 + $0xfb8] sm:$0xff] }
  0xd4   : > { %2908 = vmatpush1.bf16.msra.mxu1 %v2907_v56  ;;  %2878 = vmatprep.subr.bf16.mxu0 %v2877_v57  ;;  %v2929_v56 = vpack.c.bf16 %v1185_v51, %v1173_v50  ;;  %v1172_v57 = vld [vmem:[#allocation2 + $0xe60] sm:$0xff]  ;;  %v1117_v50 = vld [vmem:[#allocation2 + $0xca8] sm:$0xff]  ;;  %v1107_v51 = vld [vmem:[#allocation2 + $0xc58] sm:$0xff] }
  0xd5   : > { %2910 = vmatprep.subr.bf16.mxu1 %v2909_v62  ;;  %v1186_v62 = vld [vmem:[#allocation2 + $0xed0] sm:$0xff]  ;;  %v2931_v4 = vpack.c.bf16 %v1184_v58, %v1172_v57  ;;  %v1116_v57 = vld [vmem:[#allocation2 + $0xca0] sm:$0xff] }
  0xd6   : > { %v1106_v58 = vld [vmem:[#allocation2 + $0xc50] sm:$0xff] }
  0xd7   : > { %2880 = vmatpush1.bf16.msra.mxu0 %v2879_v5  ;;  %v2963_v5 = vpack.c.bf16 %v1186_v62, %v1174_v59  ;;  %v3013_v59 = vpack.c.bf16 %v1119_v52, %v1107_v51  ;;  %v1129_v62 = vld [vmem:[#allocation2 + $0xd08] sm:$0xff]  ;;  %v1239_v51 = vld [vmem:[#allocation2 + $0x1078] sm:$0xff] }
  0xd8   : > { %2912 = vmatpush1.bf16.msra.mxu1 %v2911_v6  ;;  %2882 = vmatprep.subr.bf16.mxu0 %v2881_v7  ;;  %v2933_v6 = vpack.c.bf16 %v1209_v1, %v1197_v63  ;;  %v1196_v7 = vld [vmem:[#allocation2 + $0xf20] sm:$0xff]  ;;  %v1141_v63 = vld [vmem:[#allocation2 + $0xd68] sm:$0xff]  ;;  %v1131_v1 = vld [vmem:[#allocation2 + $0xd18] sm:$0xff] }
  0xd9   : > { %2914 = vmatprep.subr.bf16.mxu1 %v2913_v11  ;;  %v1210_v11 = vld [vmem:[#allocation2 + $0xf90] sm:$0xff]  ;;  %v2935_v16 = vpack.c.bf16 %v1208_v8, %v1196_v7  ;;  %v1140_v7 = vld [vmem:[#allocation2 + $0xd60] sm:$0xff] }
  0xda   : > { %v1130_v8 = vld [vmem:[#allocation2 + $0xd10] sm:$0xff] }
  0xdb   : > { %2884 = vmatpush1.bf16.msra.mxu0 %v2883_v17  ;;  %v2967_v17 = vpack.c.bf16 %v1210_v11, %v1198_v9  ;;  %v3017_v9 = vpack.c.bf16 %v1143_v2, %v1131_v1  ;;  %v1153_v11 = vld [vmem:[#allocation2 + $0xdc8] sm:$0xff]  ;;  %v1263_v1 = vld [vmem:[#allocation2 + $0x1138] sm:$0xff] }
  0xdc   : > { %2916 = vmatpush1.bf16.msra.mxu1 %v2915_v46  ;;  %2918 = vmatprep.subr.bf16.mxu0 %v2917_v18  ;;  %v2937_v46 = vpack.c.bf16 %v1233_v13, %v1221_v12  ;;  %v1220_v18 = vld [vmem:[#allocation2 + $0xfe0] sm:$0xff]  ;;  %v1165_v12 = vld [vmem:[#allocation2 + $0xe28] sm:$0xff]  ;;  %v1155_v13 = vld [vmem:[#allocation2 + $0xdd8] sm:$0xff] }
  0xdd   : > { %2950 = vmatprep.subr.bf16.mxu1 %v2949_v22  ;;  %v1234_v22 = vld [vmem:[#allocation2 + $0x1050] sm:$0xff]  ;;  %v2939_v27 = vpack.c.bf16 %v1232_v19, %v1220_v18  ;;  %v1164_v18 = vld [vmem:[#allocation2 + $0xe20] sm:$0xff] }
  0xde   : > { %1353 = vmatmul.mubr.f32.vlgmr.msra.gmra.mrb[12].mxu0 %v3587_v28  ;;  %v1154_v19 = vld [vmem:[#allocation2 + $0xdd0] sm:$0xff] }
  0xdf   : > { %1430 = vmatmul.mubr.f32.vlgmr.msra.gmra.mrb[12].mxu1 %v3587_v28  ;;  %2920 = vmatpush1.bf16.msra.mxu0 %v2919_v29  ;;  %v2971_v29 = vpack.c.bf16 %v1234_v22, %v1222_v20  ;;  %v3021_v20 = vpack.c.bf16 %v1167_v14, %v1155_v13  ;;  %v1177_v22 = vld [vmem:[#allocation2 + $0xe88] sm:$0xff]  ;;  %v1287_v13 = vld [vmem:[#allocation2 + $0x11f8] sm:$0xff] }
  0xe0   : > { %2952 = vmatpush1.bf16.msra.mxu1 %v2951_v30  ;;  %2922 = vmatprep.subr.bf16.mxu0 %v2921_v61  ;;  %v2941_v30 = vpack.c.bf16 %v1257_v24, %v1245_v23  ;;  %v1244_v61 = vld [vmem:[#allocation2 + $0x10a0] sm:$0xff]  ;;  %v1189_v23 = vld [vmem:[#allocation2 + $0xee8] sm:$0xff]  ;;  %v1179_v24 = vld [vmem:[#allocation2 + $0xe98] sm:$0xff] }
  0xe1   : > { %2954 = vmatprep.subr.bf16.mxu1 %v2953_v34  ;;  %1358 = vmatprep.mubr.f32.mxu0 %v3409_v0  ;;  %v1258_v34 = vld [vmem:[#allocation2 + $0x1110] sm:$0xff]  ;;  %v2943_v39 = vpack.c.bf16 %v1256_v31, %v1244_v61  ;;  %v1188_v61 = vld [vmem:[#allocation2 + $0xee0] sm:$0xff] }
  0xe2   : > { %1435 = vmatprep.mubr.f32.mxu1 %v3409_v0  ;;  %1359 = vmatmul.mubr.f32.gmra.mrb[14].mxu0 %v3592_v41  ;;  %v1178_v31 = vld [vmem:[#allocation2 + $0xe90] sm:$0xff] }
  0xe3   : > { %2924 = vmatpush1.bf16.msra.mxu0 %v2923_v40  ;;  %1436 = vmatmul.mubr.f32.gmra.mrb[14].mxu1 %v3592_v41  ;;  %v2975_v40 = vpack.c.bf16 %v1258_v34, %v1246_v32  ;;  %v3025_v32 = vpack.c.bf16 %v1191_v25, %v1179_v24  ;;  %v1201_v34 = vld [vmem:[#allocation2 + $0xf48] sm:$0xff]  ;;  %v257_v24 = vld [vmem:[#allocation2 + $0x78] sm:$0xff] }
  0xe4   : > { %2956 = vmatpush1.bf16.msra.mxu1 %v2955_v42  ;;  %2926 = vmatprep.subr.bf16.mxu0 %v2925_v43  ;;  %v2945_v42 = vpack.c.bf16 %v1281_v36, %v1269_v35  ;;  %v1268_v43 = vld [vmem:[#allocation2 + $0x1160] sm:$0xff]  ;;  %v1213_v35 = vld [vmem:[#allocation2 + $0xfa8] sm:$0xff]  ;;  %v1203_v36 = vld [vmem:[#allocation2 + $0xf58] sm:$0xff] }
  0xe5   : > { %2958 = vmatprep.subr.bf16.mxu1 %v2957_v48  ;;  %1506 = vmatprep.mubr.f32.mxu0 %v3409_v0  ;;  %v1282_v48 = vld [vmem:[#allocation2 + $0x11d0] sm:$0xff]  ;;  %v2947_v53 = vpack.c.bf16 %v1280_v44, %v1268_v43  ;;  %v1212_v43 = vld [vmem:[#allocation2 + $0xfa0] sm:$0xff] }
  0xe6   : > { %1583 = vmatprep.mubr.f32.mxu1 %v3409_v0  ;;  %v1202_v44 = vld [vmem:[#allocation2 + $0xf50] sm:$0xff] }
  0xe7   : > { %2928 = vmatpush1.bf16.msra.mxu0 %v2927_v54  ;;  %v2979_v54 = vpack.c.bf16 %v1282_v48, %v1270_v45  ;;  %v3029_v45 = vpack.c.bf16 %v1215_v37, %v1203_v36  ;;  %v1225_v48 = vld [vmem:[#allocation2 + $0x1008] sm:$0xff]  ;;  %v281_v36 = vld [vmem:[#allocation2 + $0x138] sm:$0xff] }
  0xe8   : > { %2960 = vmatpush1.bf16.msra.mxu1 %v2959_v55  ;;  %2930 = vmatprep.subr.bf16.mxu0 %v2929_v56  ;;  %v2981_v55 = vpack.c.bf16 %v1117_v50, %v1105_v49  ;;  %v1104_v56 = vld [vmem:[#allocation2 + $0xc40] sm:$0xff]  ;;  %v1237_v49 = vld [vmem:[#allocation2 + $0x1068] sm:$0xff]  ;;  %v1227_v50 = vld [vmem:[#allocation2 + $0x1018] sm:$0xff] }
  0xe9   : > { %2962 = vmatprep.subr.bf16.mxu1 %v2961_v60  ;;  %v1118_v60 = vld [vmem:[#allocation2 + $0xcb0] sm:$0xff]  ;;  %v2983_v3 = vpack.c.bf16 %v1116_v57, %v1104_v56  ;;  %v1236_v56 = vld [vmem:[#allocation2 + $0x1060] sm:$0xff] }
  0xea   : > { %v1226_v57 = vld [vmem:[#allocation2 + $0x1010] sm:$0xff] }
  0xeb   : > { %2932 = vmatpush1.bf16.msra.mxu0 %v2931_v4  ;;  %v3015_v4 = vpack.c.bf16 %v1118_v60, %v1106_v58  ;;  %v3033_v58 = vpack.c.bf16 %v1239_v51, %v1227_v50  ;;  %v1249_v60 = vld [vmem:[#allocation2 + $0x10c8] sm:$0xff]  ;;  %v305_v50 = vld [vmem:[#allocation2 + $0x1f8] sm:$0xff] }
  0xec   : > { %2964 = vmatpush1.bf16.msra.mxu1 %v2963_v5  ;;  %2934 = vmatprep.subr.bf16.mxu0 %v2933_v6  ;;  %v2985_v5 = vpack.c.bf16 %v1141_v63, %v1129_v62  ;;  %v1128_v6 = vld [vmem:[#allocation2 + $0xd00] sm:$0xff]  ;;  %v1261_v62 = vld [vmem:[#allocation2 + $0x1128] sm:$0xff]  ;;  %v1251_v63 = vld [vmem:[#allocation2 + $0x10d8] sm:$0xff] }
  0xed   : > { %2966 = vmatprep.subr.bf16.mxu1 %v2965_v10  ;;  %v1142_v10 = vld [vmem:[#allocation2 + $0xd70] sm:$0xff]  ;;  %v2987_v15 = vpack.c.bf16 %v1140_v7, %v1128_v6  ;;  %v1260_v6 = vld [vmem:[#allocation2 + $0x1120] sm:$0xff] }
  0xee   : > { %v1250_v7 = vld [vmem:[#allocation2 + $0x10d0] sm:$0xff] }
  0xef   : > { %2936 = vmatpush1.bf16.msra.mxu0 %v2935_v16  ;;  %v3019_v16 = vpack.c.bf16 %v1142_v10, %v1130_v8  ;;  %v3037_v8 = vpack.c.bf16 %v1263_v1, %v1251_v63  ;;  %v1273_v10 = vld [vmem:[#allocation2 + $0x1188] sm:$0xff]  ;;  %v329_v63 = vld [vmem:[#allocation2 + $0x2b8] sm:$0xff] }
  0xf0   : > { %2968 = vmatpush1.bf16.msra.mxu1 %v2967_v17  ;;  %2938 = vmatprep.subr.bf16.mxu0 %v2937_v46  ;;  %v2989_v17 = vpack.c.bf16 %v1165_v12, %v1153_v11  ;;  %v1152_v46 = vld [vmem:[#allocation2 + $0xdc0] sm:$0xff]  ;;  %v1285_v11 = vld [vmem:[#allocation2 + $0x11e8] sm:$0xff]  ;;  %v1275_v12 = vld [vmem:[#allocation2 + $0x1198] sm:$0xff] }
  0xf1   : > { %2970 = vmatprep.subr.bf16.mxu1 %v2969_v21  ;;  %v1166_v21 = vld [vmem:[#allocation2 + $0xe30] sm:$0xff]  ;;  %v2991_v26 = vpack.c.bf16 %v1164_v18, %v1152_v46  ;;  %v1284_v46 = vld [vmem:[#allocation2 + $0x11e0] sm:$0xff] }
  0xf2   : > { %v1274_v18 = vld [vmem:[#allocation2 + $0x1190] sm:$0xff] }
  0xf3   : > { %2940 = vmatpush1.bf16.msra.mxu0 %v2939_v27  ;;  %v3023_v27 = vpack.c.bf16 %v1166_v21, %v1154_v19  ;;  %v3041_v19 = vpack.c.bf16 %v1287_v13, %v1275_v12  ;;  %v243_v21 = vld [vmem:[#allocation2 + $0x8] sm:$0xff] }
  0xf4   : > { %2972 = vmatpush1.bf16.msra.mxu1 %v2971_v29  ;;  %2942 = vmatprep.subr.bf16.mxu0 %v2941_v30  ;;  %v2993_v29 = vpack.c.bf16 %v1189_v23, %v1177_v22  ;;  %v1176_v30 = vld [vmem:[#allocation2 + $0xe80] sm:$0xff]  ;;  %v255_v22 = vld [vmem:[#allocation2 + $0x68] sm:$0xff]  ;;  %v245_v23 = vld [vmem:[#allocation2 + $0x18] sm:$0xff] }
  0xf5   : > { %2974 = vmatprep.subr.bf16.mxu1 %v2973_v33  ;;  %v1190_v33 = vld [vmem:[#allocation2 + $0xef0] sm:$0xff]  ;;  %v2995_v38 = vpack.c.bf16 %v1188_v61, %v1176_v30  ;;  %v254_v30 = vld [vmem:[#allocation2 + $0x60] sm:$0xff] }
  0xf6   : > { %v244_v61 = vld [vmem:[#allocation2 + $0x10] sm:$0xff] }
  0xf7   : > { %2944 = vmatpush1.bf16.msra.mxu0 %v2943_v39  ;;  %v3027_v39 = vpack.c.bf16 %v1190_v33, %v1178_v31  ;;  %v3077_v31 = vpack.c.bf16 %v257_v24, %v245_v23  ;;  %v267_v33 = vld [vmem:[#allocation2 + $0xc8] sm:$0xff] }
  0xf8   : > { %2976 = vmatpush1.bf16.msra.mxu1 %v2975_v40  ;;  %2946 = vmatprep.subr.bf16.mxu0 %v2945_v42  ;;  %v2997_v40 = vpack.c.bf16 %v1213_v35, %v1201_v34  ;;  %v1200_v42 = vld [vmem:[#allocation2 + $0xf40] sm:$0xff]  ;;  %v279_v34 = vld [vmem:[#allocation2 + $0x128] sm:$0xff]  ;;  %v269_v35 = vld [vmem:[#allocation2 + $0xd8] sm:$0xff] }
  0xf9   : > { %2978 = vmatprep.subr.bf16.mxu1 %v2977_v47  ;;  %v1214_v47 = vld [vmem:[#allocation2 + $0xfb0] sm:$0xff]  ;;  %v2999_v52 = vpack.c.bf16 %v1212_v43, %v1200_v42  ;;  %v278_v42 = vld [vmem:[#allocation2 + $0x120] sm:$0xff] }
  0xfa   : > { %v268_v43 = vld [vmem:[#allocation2 + $0xd0] sm:$0xff] }
  0xfb   : > { %2948 = vmatpush1.bf16.msra.mxu0 %v2947_v53  ;;  %v3031_v53 = vpack.c.bf16 %v1214_v47, %v1202_v44  ;;  %v3081_v44 = vpack.c.bf16 %v281_v36, %v269_v35  ;;  %v291_v47 = vld [vmem:[#allocation2 + $0x188] sm:$0xff] }
  0xfc   : > { %2980 = vmatpush1.bf16.msra.mxu1 %v2979_v54  ;;  %2982 = vmatprep.subr.bf16.mxu0 %v2981_v55  ;;  %v3001_v54 = vpack.c.bf16 %v1237_v49, %v1225_v48  ;;  %v1224_v55 = vld [vmem:[#allocation2 + $0x1000] sm:$0xff]  ;;  %v303_v48 = vld [vmem:[#allocation2 + $0x1e8] sm:$0xff]  ;;  %v293_v49 = vld [vmem:[#allocation2 + $0x198] sm:$0xff] }
  0xfd   : > { %3014 = vmatprep.subr.bf16.mxu1 %v3013_v59  ;;  %v1238_v59 = vld [vmem:[#allocation2 + $0x1070] sm:$0xff]  ;;  %v3003_v2 = vpack.c.bf16 %v1236_v56, %v1224_v55  ;;  %v302_v55 = vld [vmem:[#allocation2 + $0x1e0] sm:$0xff] }
  0xfe   : > { %1507 = vmatmul.mubr.f32.vlgmr.msra.gmra.mrb[16].mxu0 %v3587_v28  ;;  %v292_v56 = vld [vmem:[#allocation2 + $0x190] sm:$0xff] }
  0xff   : > { %1584 = vmatmul.mubr.f32.vlgmr.msra.gmra.mrb[16].mxu1 %v3587_v28  ;;  %2984 = vmatpush1.bf16.msra.mxu0 %v2983_v3  ;;  %v3035_v3 = vpack.c.bf16 %v1238_v59, %v1226_v57  ;;  %v3085_v57 = vpack.c.bf16 %v305_v50, %v293_v49  ;;  %v315_v59 = vld [vmem:[#allocation2 + $0x248] sm:$0xff] }
 0x100   : > { %3016 = vmatpush1.bf16.msra.mxu1 %v3015_v4  ;;  %2986 = vmatprep.subr.bf16.mxu0 %v2985_v5  ;;  %v3005_v4 = vpack.c.bf16 %v1261_v62, %v1249_v60  ;;  %v1248_v5 = vld [vmem:[#allocation2 + $0x10c0] sm:$0xff]  ;;  %v327_v60 = vld [vmem:[#allocation2 + $0x2a8] sm:$0xff]  ;;  %v317_v62 = vld [vmem:[#allocation2 + $0x258] sm:$0xff] }
 0x101   : > { %3018 = vmatprep.subr.bf16.mxu1 %v3017_v9  ;;  %1512 = vmatprep.mubr.f32.mxu0 %v3409_v0  ;;  %v1262_v9 = vld [vmem:[#allocation2 + $0x1130] sm:$0xff]  ;;  %v3007_v14 = vpack.c.bf16 %v1260_v6, %v1248_v5  ;;  %v3089_v6 = vpack.c.bf16 %v329_v63, %v317_v62 }
 0x102   : > { %1589 = vmatprep.mubr.f32.mxu1 %v3409_v0  ;;  %1513 = vmatmul.mubr.f32.gmra.mrb[18].mxu0 %v3592_v41  ;;  %v316_v5 = vld [vmem:[#allocation2 + $0x250] sm:$0xff] }
 0x103   : > { %2988 = vmatpush1.bf16.msra.mxu0 %v2987_v15  ;;  %1590 = vmatmul.mubr.f32.gmra.mrb[18].mxu1 %v3592_v41  ;;  %v3039_v15 = vpack.c.bf16 %v1262_v9, %v1250_v7  ;;  %v328_v7 = vld [vmem:[#allocation2 + $0x2b0] sm:$0xff]  ;;  %v351_v9 = vld [vmem:[#allocation2 + $0x368] sm:$0xff] }
 0x104   : > { %3020 = vmatpush1.bf16.msra.mxu1 %v3019_v16  ;;  %2990 = vmatprep.subr.bf16.mxu0 %v2989_v17  ;;  %v3009_v16 = vpack.c.bf16 %v1285_v11, %v1273_v10  ;;  %v1272_v17 = vld [vmem:[#allocation2 + $0x1180] sm:$0xff]  ;;  %v341_v10 = vld [vmem:[#allocation2 + $0x318] sm:$0xff]  ;;  %v3091_v12 = vpack.c.bf16 %v328_v7, %v316_v5  ;;  %v271_v5 = vld [vmem:[#allocation2 + $0xe8] sm:$0xff] }
 0x105   : > { %3022 = vmatprep.subr.bf16.mxu1 %v3021_v20  ;;  %1660 = vmatprep.mubr.f32.mxu0 %v3409_v0  ;;  %v1286_v20 = vld [vmem:[#allocation2 + $0x11f0] sm:$0xff]  ;;  %v3011_v25 = vpack.c.bf16 %v1284_v46, %v1272_v17  ;;  %v353_v11 = vld [vmem:[#allocation2 + $0x378] sm:$0xff]  ;;  %v3617_v7 = vld [vmem:[%s3554_s30] sm:$0xff] }
 0x106   : > { %1737 = vmatprep.mubr.f32.mxu1 %v3409_v0  ;;  %v3093_v17 = vpack.c.bf16 %v353_v11, %v341_v10  ;;  %v352_v46 = vld [vmem:[#allocation2 + $0x370] sm:$0xff]  ;;  %v285_v10 = vld [vmem:[#allocation2 + $0x158] sm:$0xff] }
 0x107   : > { %2992 = vmatpush1.bf16.msra.mxu0 %v2991_v26  ;;  %v3043_v26 = vpack.c.bf16 %v1286_v20, %v1274_v18  ;;  %v363_v18 = vld [vmem:[#allocation2 + $0x3c8] sm:$0xff]  ;;  %v365_v20 = vld [vmem:[#allocation2 + $0x3d8] sm:$0xff] }
 0x108   : > { %3024 = vmatpush1.bf16.msra.mxu1 %v3023_v27  ;;  %2994 = vmatprep.subr.bf16.mxu0 %v2993_v29  ;;  %v3045_v27 = vpack.c.bf16 %v255_v22, %v243_v21  ;;  %v242_v29 = vld [vmem:[#allocation2] sm:$0xff]  ;;  %v377_v21 = vld [vmem:[#allocation2 + $0x438] sm:$0xff] }
 0x109   : > { %3026 = vmatprep.subr.bf16.mxu1 %v3025_v32  ;;  %v256_v32 = vld [vmem:[#allocation2 + $0x70] sm:$0xff]  ;;  %v3047_v37 = vpack.c.bf16 %v254_v30, %v242_v29  ;;  %v3097_v29 = vpack.c.bf16 %v377_v21, %v365_v20  ;;  %v3622_v20 = vld [vmem:[%s3554_s30 + $0x8] sm:$0xff] }
 0x10a   : > { %v376_v30 = vld [vmem:[#allocation2 + $0x430] sm:$0xff] }
 0x10b   : > { %2996 = vmatpush1.bf16.msra.mxu0 %v2995_v38  ;;  %v3079_v38 = vpack.c.bf16 %v256_v32, %v244_v61  ;;  %v387_v61 = vld [vmem:[#allocation2 + $0x488] sm:$0xff]  ;;  %v389_v32 = vld [vmem:[#allocation2 + $0x498] sm:$0xff] }
 0x10c   : > { %3028 = vmatpush1.bf16.msra.mxu1 %v3027_v39  ;;  %2998 = vmatprep.subr.bf16.mxu0 %v2997_v40  ;;  %v3049_v39 = vpack.c.bf16 %v279_v34, %v267_v33  ;;  %v266_v40 = vld [vmem:[#allocation2 + $0xc0] sm:$0xff]  ;;  %v401_v33 = vld [vmem:[#allocation2 + $0x4f8] sm:$0xff] }
 0x10d   : > { %3030 = vmatprep.subr.bf16.mxu1 %v3029_v45  ;;  %v280_v45 = vld [vmem:[#allocation2 + $0x130] sm:$0xff]  ;;  %v3051_v51 = vpack.c.bf16 %v278_v42, %v266_v40  ;;  %v3101_v40 = vpack.c.bf16 %v401_v33, %v389_v32  ;;  %v333_v32 = vld [vmem:[#allocation2 + $0x2d8] sm:$0xff] }
 0x10e   : > { %v400_v42 = vld [vmem:[#allocation2 + $0x4f0] sm:$0xff] }
 0x10f   : > { %3000 = vmatpush1.bf16.msra.mxu0 %v2999_v52  ;;  %v3083_v52 = vpack.c.bf16 %v280_v45, %v268_v43  ;;  %v411_v43 = vld [vmem:[#allocation2 + $0x548] sm:$0xff]  ;;  %v413_v45 = vld [vmem:[#allocation2 + $0x558] sm:$0xff] }
 0x110   : > { %3032 = vmatpush1.bf16.msra.mxu1 %v3031_v53  ;;  %3002 = vmatprep.subr.bf16.mxu0 %v3001_v54  ;;  %v3053_v53 = vpack.c.bf16 %v303_v48, %v291_v47  ;;  %v290_v54 = vld [vmem:[#allocation2 + $0x180] sm:$0xff]  ;;  %v425_v47 = vld [vmem:[#allocation2 + $0x5b8] sm:$0xff] }
 0x111   : > { %3034 = vmatprep.subr.bf16.mxu1 %v3033_v58  ;;  %v304_v58 = vld [vmem:[#allocation2 + $0x1f0] sm:$0xff] }
 0x112   : > { %v3087_v1 = vpack.c.bf16 %v304_v58, %v292_v56  ;;  %v247_v56 = vld [vmem:[#allocation2 + $0x28] sm:$0xff]  ;;  %v249_v58 = vld [vmem:[#allocation2 + $0x38] sm:$0xff] }
 0x113   : > { %3004 = vmatpush1.bf16.msra.mxu0 %v3003_v2  ;;  %v3057_v2 = vpack.c.bf16 %v327_v60, %v315_v59  ;;  %v261_v59 = vld [vmem:[#allocation2 + $0x98] sm:$0xff] }
 0x114   : > { %3036 = vmatpush1.bf16.msra.mxu1 %v3035_v3  ;;  %3006 = vmatprep.subr.bf16.mxu0 %v3005_v4  ;;  %v314_v3 = vld [vmem:[#allocation2 + $0x240] sm:$0xff] }
 0x115   : > { %3038 = vmatprep.subr.bf16.mxu1 %v3037_v8  ;;  %v326_v4 = vld [vmem:[#allocation2 + $0x2a0] sm:$0xff]  ;;  %v339_v8 = vld [vmem:[#allocation2 + $0x308] sm:$0xff] }
 0x116   : > { %v3061_v13 = vpack.c.bf16 %v351_v9, %v339_v8  ;;  %v273_v9 = vld [vmem:[#allocation2 + $0xf8] sm:$0xff] }
 0x117   : > { %3008 = vmatpush1.bf16.msra.mxu0 %v3007_v14  ;;  %v338_v14 = vld [vmem:[#allocation2 + $0x300] sm:$0xff] }
 0x118   : > { %3040 = vmatpush1.bf16.msra.mxu1 %v3039_v15  ;;  %3010 = vmatprep.subr.bf16.mxu0 %v3009_v16  ;;  %v350_v15 = vld [vmem:[#allocation2 + $0x360] sm:$0xff]  ;;  %v340_v16 = vld [vmem:[#allocation2 + $0x310] sm:$0xff] }
 0x119   : > { %3042 = vmatprep.subr.bf16.mxu1 %v3041_v19  ;;  %v375_v19 = vld [vmem:[#allocation2 + $0x428] sm:$0xff]  ;;  %v3063_v22 = vpack.c.bf16 %v350_v15, %v338_v14  ;;  %v3095_v23 = vpack.c.bf16 %v352_v46, %v340_v16  ;;  %v284_v15 = vld [vmem:[#allocation2 + $0x150] sm:$0xff]  ;;  %v3145_v46 = vpack.c.bf16 %v285_v10, %v273_v9 }
 0x11a   : > { %v3065_v24 = vpack.c.bf16 %v375_v19, %v363_v18  ;;  %v295_v16 = vld [vmem:[#allocation2 + $0x1a8] sm:$0xff]  ;;  %v297_v18 = vld [vmem:[#allocation2 + $0x1b8] sm:$0xff] }
 0x11b   : > { %3012 = vmatpush1.bf16.msra.mxu0 %v3011_v25  ;;  %v362_v25 = vld [vmem:[#allocation2 + $0x3c0] sm:$0xff]  ;;  %v309_v19 = vld [vmem:[#allocation2 + $0x218] sm:$0xff] }
 0x11c   : > { %3044 = vmatpush1.bf16.msra.mxu1 %v3043_v26  ;;  %3046 = vmatprep.subr.bf16.mxu0 %v3045_v27  ;;  %v374_v26 = vld [vmem:[#allocation2 + $0x420] sm:$0xff]  ;;  %v364_v27 = vld [vmem:[#allocation2 + $0x3d0] sm:$0xff] }
 0x11d   : > { %3078 = vmatprep.subr.bf16.mxu1 %v3077_v31  ;;  %v399_v31 = vld [vmem:[#allocation2 + $0x4e8] sm:$0xff]  ;;  %v3067_v34 = vpack.c.bf16 %v374_v26, %v362_v25  ;;  %v3099_v35 = vpack.c.bf16 %v376_v30, %v364_v27  ;;  %v306_v25 = vld [vmem:[#allocation2 + $0x200] sm:$0xff]  ;;  %v296_v26 = vld [vmem:[#allocation2 + $0x1b0] sm:$0xff]  ;;  %v3149_v27 = vpack.c.bf16 %v309_v19, %v297_v18 }
 0x11e   : > { %1661 = vmatmul.mubr.f32.vlgmr.msra.gmra.mrb[20].mxu0 %v3587_v28  ;;  %v3069_v36 = vpack.c.bf16 %v399_v31, %v387_v61  ;;  %v319_v30 = vld [vmem:[#allocation2 + $0x268] sm:$0xff]  ;;  %v321_v31 = vld [vmem:[#allocation2 + $0x278] sm:$0xff] }
 0x11f   : > { %1738 = vmatmul.mubr.f32.vlgmr.msra.gmra.mrb[20].mxu1 %v3587_v28  ;;  %3048 = vmatpush1.bf16.msra.mxu0 %v3047_v37  ;;  %v3055_v28 = vpack.c.bf16 %v302_v55, %v290_v54  ;;  %v386_v37 = vld [vmem:[#allocation2 + $0x480] sm:$0xff]  ;;  %v3105_v54 = vpack.c.bf16 %v425_v47, %v413_v45  ;;  %v424_v55 = vld [vmem:[#allocation2 + $0x5b0] sm:$0xff]  ;;  %v331_v61 = vld [vmem:[#allocation2 + $0x2c8] sm:$0xff] }
 0x120   : > { %3080 = vmatpush1.bf16.msra.mxu1 %v3079_v38  ;;  %3050 = vmatprep.subr.bf16.mxu0 %v3049_v39  ;;  %v398_v38 = vld [vmem:[#allocation2 + $0x4e0] sm:$0xff]  ;;  %v388_v39 = vld [vmem:[#allocation2 + $0x490] sm:$0xff]  ;;  %v357_v45 = vld [vmem:[#allocation2 + $0x398] sm:$0xff] }
 0x121   : > { %3082 = vmatprep.subr.bf16.mxu1 %v3081_v44  ;;  %1666 = vmatprep.mubr.f32.mxu0 %v3409_v0  ;;  %v423_v44 = vld [vmem:[#allocation2 + $0x5a8] sm:$0xff]  ;;  %v3071_v48 = vpack.c.bf16 %v398_v38, %v386_v37  ;;  %v3103_v49 = vpack.c.bf16 %v400_v42, %v388_v39  ;;  %v330_v37 = vld [vmem:[#allocation2 + $0x2c0] sm:$0xff]  ;;  %v320_v38 = vld [vmem:[#allocation2 + $0x270] sm:$0xff]  ;;  %v3153_v39 = vpack.c.bf16 %v333_v32, %v321_v31 }
 0x122   : > { %1743 = vmatprep.mubr.f32.mxu1 %v3409_v0  ;;  %1667 = vmatmul.mubr.f32.gmra.mrb[22].mxu0 %v3592_v41  ;;  %v3073_v50 = vpack.c.bf16 %v423_v44, %v411_v43  ;;  %v343_v42 = vld [vmem:[#allocation2 + $0x328] sm:$0xff]  ;;  %v345_v44 = vld [vmem:[#allocation2 + $0x338] sm:$0xff] }
 0x123   : > { %3052 = vmatpush1.bf16.msra.mxu0 %v3051_v51  ;;  %1744 = vmatmul.mubr.f32.gmra.mrb[22].mxu1 %v3592_v41  ;;  %v3059_v41 = vpack.c.bf16 %v326_v4, %v314_v3  ;;  %v410_v51 = vld [vmem:[#allocation2 + $0x540] sm:$0xff]  ;;  %v248_v3 = vld [vmem:[#allocation2 + $0x30] sm:$0xff]  ;;  %v355_v43 = vld [vmem:[#allocation2 + $0x388] sm:$0xff] }
 0x124   : > { %3084 = vmatpush1.bf16.msra.mxu1 %v3083_v52  ;;  %3054 = vmatprep.subr.bf16.mxu0 %v3053_v53  ;;  %v422_v52 = vld [vmem:[#allocation2 + $0x5a0] sm:$0xff]  ;;  %v412_v53 = vld [vmem:[#allocation2 + $0x550] sm:$0xff] }
 0x125   : > { %3086 = vmatprep.subr.bf16.mxu1 %v3085_v57  ;;  %1814 = vmatprep.mubr.f32.mxu0 %v3409_v0  ;;  %v259_v57 = vld [vmem:[#allocation2 + $0x88] sm:$0xff]  ;;  %v3075_v60 = vpack.c.bf16 %v422_v52, %v410_v51  ;;  %v3107_v62 = vpack.c.bf16 %v424_v55, %v412_v53  ;;  %v260_v4 = vld [vmem:[#allocation2 + $0x90] sm:$0xff]  ;;  %v354_v51 = vld [vmem:[#allocation2 + $0x380] sm:$0xff]  ;;  %v3157_v53 = vpack.c.bf16 %v357_v45, %v345_v44 }
 0x126   : > { %1891 = vmatprep.mubr.f32.mxu1 %v3409_v0  ;;  %v3109_v63 = vpack.c.bf16 %v259_v57, %v247_v56  ;;  %v3143_v11 = vpack.c.bf16 %v260_v4, %v248_v3  ;;  %v344_v52 = vld [vmem:[#allocation2 + $0x330] sm:$0xff]  ;;  %v367_v55 = vld [vmem:[#allocation2 + $0x3e8] sm:$0xff]  ;;  %v369_v57 = vld [vmem:[#allocation2 + $0x3f8] sm:$0xff] }
 0x127   : > { %3056 = vmatpush1.bf16.msra.mxu0 %v3055_v28  ;;  %v246_v28 = vld [vmem:[#allocation2 + $0x20] sm:$0xff]  ;;  %v379_v56 = vld [vmem:[#allocation2 + $0x448] sm:$0xff]  ;;  %v380_v3 = vld [vmem:[#allocation2 + $0x450] sm:$0xff] }
 0x128   : > { %3088 = vmatpush1.bf16.msra.mxu1 %v3087_v1  ;;  %3058 = vmatprep.subr.bf16.mxu0 %v3057_v2  ;;  %v258_v1 = vld [vmem:[#allocation2 + $0x80] sm:$0xff]  ;;  %v3141_v2 = vpack.c.bf16 %v261_v59, %v249_v58  ;;  %v381_v58 = vld [vmem:[#allocation2 + $0x458] sm:$0xff]  ;;  %v391_v4 = vld [vmem:[#allocation2 + $0x4a8] sm:$0xff] }
 0x129   : > { %3090 = vmatprep.subr.bf16.mxu1 %v3089_v6  ;;  %v283_v6 = vld [vmem:[#allocation2 + $0x148] sm:$0xff]  ;;  %v3111_v8 = vpack.c.bf16 %v258_v1, %v246_v28  ;;  %v378_v28 = vld [vmem:[#allocation2 + $0x440] sm:$0xff]  ;;  %v368_v1 = vld [vmem:[#allocation2 + $0x3f0] sm:$0xff] }
 0x12a   : > { %v3113_v14 = vpack.c.bf16 %v283_v6, %v271_v5  ;;  %v403_v5 = vld [vmem:[#allocation2 + $0x508] sm:$0xff]  ;;  %v393_v6 = vld [vmem:[#allocation2 + $0x4b8] sm:$0xff]  ;;  %v3163_v10 = vpack.c.bf16 %v380_v3, %v368_v1 }
 0x12b   : > { %3060 = vmatpush1.bf16.msra.mxu0 %v3059_v41  ;;  %v270_v41 = vld [vmem:[#allocation2 + $0xe0] sm:$0xff]  ;;  %v289_v3 = vld [vmem:[#allocation2 + $0x178] sm:$0xff] }
 0x12c   : > { %3092 = vmatpush1.bf16.msra.mxu1 %v3091_v12  ;;  %3062 = vmatprep.subr.bf16.mxu0 %v3061_v13  ;;  %v282_v12 = vld [vmem:[#allocation2 + $0x140] sm:$0xff]  ;;  %v272_v13 = vld [vmem:[#allocation2 + $0xf0] sm:$0xff] }
 0x12d   : > { %3094 = vmatprep.subr.bf16.mxu1 %v3093_v17  ;;  %v307_v17 = vld [vmem:[#allocation2 + $0x208] sm:$0xff]  ;;  %v3115_v21 = vpack.c.bf16 %v282_v12, %v270_v41  ;;  %v390_v41 = vld [vmem:[#allocation2 + $0x4a0] sm:$0xff] }
 0x12e   : > { %v402_v12 = vld [vmem:[#allocation2 + $0x500] sm:$0xff] }
 0x12f   : > { %3064 = vmatpush1.bf16.msra.mxu0 %v3063_v22  ;;  %v3147_v22 = vpack.c.bf16 %v284_v15, %v272_v13  ;;  %v392_v13 = vld [vmem:[#allocation2 + $0x4b0] sm:$0xff] }
 0x130   : > { %3096 = vmatpush1.bf16.msra.mxu1 %v3095_v23  ;;  %3066 = vmatprep.subr.bf16.mxu0 %v3065_v24  ;;  %v3117_v23 = vpack.c.bf16 %v307_v17, %v295_v16  ;;  %v294_v24 = vld [vmem:[#allocation2 + $0x1a0] sm:$0xff]  ;;  %v404_v16 = vld [vmem:[#allocation2 + $0x510] sm:$0xff]  ;;  %v415_v17 = vld [vmem:[#allocation2 + $0x568] sm:$0xff] }
 0x131   : > { %3098 = vmatprep.subr.bf16.mxu1 %v3097_v29  ;;  %v308_v29 = vld [vmem:[#allocation2 + $0x210] sm:$0xff]  ;;  %v3119_v33 = vpack.c.bf16 %v306_v25, %v294_v24  ;;  %v3135_v25 = vpack.c.bf16 %v402_v12, %v390_v41  ;;  %v311_v41 = vld [vmem:[#allocation2 + $0x228] sm:$0xff] }
 0x133   : > { %3068 = vmatpush1.bf16.msra.mxu0 %v3067_v34  ;;  %v3151_v34 = vpack.c.bf16 %v308_v29, %v296_v26  ;;  %v426_v26 = vld [vmem:[#allocation2 + $0x5c0] sm:$0xff]  ;;  %v428_v29 = vld [vmem:[#allocation2 + $0x5d0] sm:$0xff] }
 0x134   : > { %3100 = vmatpush1.bf16.msra.mxu1 %v3099_v35  ;;  %3070 = vmatprep.subr.bf16.mxu0 %v3069_v36  ;;  %v3121_v35 = vpack.c.bf16 %v331_v61, %v319_v30  ;;  %v318_v36 = vld [vmem:[#allocation2 + $0x260] sm:$0xff]  ;;  %v3167_v30 = vpack.c.bf16 %v404_v16, %v392_v13  ;;  %v301_v13 = vld [vmem:[#allocation2 + $0x1d8] sm:$0xff] }
 0x135   : > { %3102 = vmatprep.subr.bf16.mxu1 %v3101_v40  ;;  %v332_v40 = vld [vmem:[#allocation2 + $0x2d0] sm:$0xff]  ;;  %v3123_v47 = vpack.c.bf16 %v330_v37, %v318_v36 }
 0x137   : > { %3072 = vmatpush1.bf16.msra.mxu0 %v3071_v48  ;;  %v3155_v48 = vpack.c.bf16 %v332_v40, %v320_v38 }
 0x138   : > { %3104 = vmatpush1.bf16.msra.mxu1 %v3103_v49  ;;  %3074 = vmatprep.subr.bf16.mxu0 %v3073_v50  ;;  %v3125_v49 = vpack.c.bf16 %v355_v43, %v343_v42  ;;  %v342_v50 = vld [vmem:[#allocation2 + $0x320] sm:$0xff]  ;;  %v253_v42 = vld [vmem:[#allocation2 + $0x58] sm:$0xff] }
 0x139   : > { %3106 = vmatprep.subr.bf16.mxu1 %v3105_v54  ;;  %v356_v54 = vld [vmem:[#allocation2 + $0x390] sm:$0xff]  ;;  %v3127_v59 = vpack.c.bf16 %v354_v51, %v342_v50  ;;  %v265_v43 = vld [vmem:[#allocation2 + $0xb8] sm:$0xff] }
 0x13b   : > { %3076 = vmatpush1.bf16.msra.mxu0 %v3075_v60  ;;  %v3159_v60 = vpack.c.bf16 %v356_v54, %v344_v52  ;;  %v262_v54 = vld [vmem:[#allocation2 + $0xa0] sm:$0xff] }
 0x13c   : > { %3108 = vmatpush1.bf16.msra.mxu1 %v3107_v62  ;;  %3110 = vmatprep.subr.bf16.mxu0 %v3109_v63  ;;  %v3129_v62 = vpack.c.bf16 %v379_v56, %v367_v55  ;;  %v366_v63 = vld [vmem:[#allocation2 + $0x3e0] sm:$0xff]  ;;  %v3205_v56 = vpack.c.bf16 %v265_v43, %v253_v42  ;;  %v359_v42 = vld [vmem:[#allocation2 + $0x3a8] sm:$0xff]  ;;  %v349_v43 = vld [vmem:[#allocation2 + $0x358] sm:$0xff] }
 0x13d   : > { %3142 = vmatprep.subr.bf16.mxu1 %v3141_v2  ;;  %v3161_v2 = vpack.c.bf16 %v381_v58, %v369_v57  ;;  %v3131_v9 = vpack.c.bf16 %v378_v28, %v366_v63  ;;  %v252_v57 = vld [vmem:[#allocation2 + $0x50] sm:$0xff]  ;;  %v287_v63 = vld [vmem:[#allocation2 + $0x168] sm:$0xff] }
 0x13e   : > { %1815 = vmatmul.mubr.f32.vlgmr.msra.gmra.mrb[12].mxu0 %v3617_v7  ;;  %v264_v58 = vld [vmem:[#allocation2 + $0xb0] sm:$0xff] }
 0x13f   : > { %1892 = vmatmul.mubr.f32.vlgmr.msra.gmra.mrb[12].mxu1 %v3617_v7  ;;  %3112 = vmatpush1.bf16.msra.mxu0 %v3111_v8  ;;  %v405_v8 = vld [vmem:[#allocation2 + $0x518] sm:$0xff] }
 0x140   : > { %3144 = vmatpush1.bf16.msra.mxu1 %v3143_v11  ;;  %1820 = vmatprep.mubr.f32.mxu0 %v3409_v0  ;;  %v3133_v11 = vpack.c.bf16 %v403_v5, %v391_v4  ;;  %v3165_v15 = vpack.c.bf16 %v405_v8, %v393_v6  ;;  %v3207_v4 = vpack.c.bf16 %v264_v58, %v252_v57  ;;  %v274_v5 = vld [vmem:[#allocation2 + $0x100] sm:$0xff]  ;;  %v276_v8 = vld [vmem:[#allocation2 + $0x110] sm:$0xff] }
 0x141   : > { %1897 = vmatprep.mubr.f32.mxu1 %v3409_v0  ;;  %3114 = vmatprep.subr.bf16.mxu0 %v3113_v14  ;;  %v286_v6 = vld [vmem:[#allocation2 + $0x160] sm:$0xff]  ;;  %v348_v57 = vld [vmem:[#allocation2 + $0x350] sm:$0xff] }
 0x142   : > { %1821 = vmatmul.mubr.f32.gmra.mrb[14].mxu0 %v3622_v20  ;;  %3146 = vmatprep.subr.bf16.mxu1 %v3145_v46  ;;  %v427_v46 = vld [vmem:[#allocation2 + $0x5c8] sm:$0xff] }
 0x143   : > { %1898 = vmatmul.mubr.f32.gmra.mrb[14].mxu1 %v3622_v20  ;;  %3116 = vmatpush1.bf16.msra.mxu0 %v3115_v21  ;;  %v417_v21 = vld [vmem:[#allocation2 + $0x578] sm:$0xff]  ;;  %v3137_v61 = vpack.c.bf16 %v427_v46, %v415_v17  ;;  %v298_v46 = vld [vmem:[#allocation2 + $0x1c0] sm:$0xff] }
 0x144   : > { %3148 = vmatpush1.bf16.msra.mxu1 %v3147_v22  ;;  %3118 = vmatprep.subr.bf16.mxu0 %v3117_v23  ;;  %v429_v22 = vld [vmem:[#allocation2 + $0x5d8] sm:$0xff]  ;;  %v414_v23 = vld [vmem:[#allocation2 + $0x560] sm:$0xff] }
 0x145   : > { %3150 = vmatprep.subr.bf16.mxu1 %v3149_v27  ;;  %1968 = vmatprep.mubr.f32.mxu0 %v3409_v0  ;;  %v416_v27 = vld [vmem:[#allocation2 + $0x570] sm:$0xff]  ;;  %v3169_v32 = vpack.c.bf16 %v429_v22, %v417_v21 }
 0x146   : > { %2045 = vmatprep.mubr.f32.mxu1 %v3409_v0  ;;  %v3171_v40 = vpack.c.bf16 %v428_v29, %v416_v27  ;;  %v312_v22 = vld [vmem:[#allocation2 + $0x230] sm:$0xff]  ;;  %v2213_v27 = vlaneseq }
 0x147   : > { %3120 = vmatpush1.bf16.msra.mxu0 %v3119_v33  ;;  %v251_v33 = vld [vmem:[#allocation2 + $0x48] sm:$0xff] }
 0x148   : > { %3152 = vmatpush1.bf16.msra.mxu1 %v3151_v34  ;;  %3122 = vmatprep.subr.bf16.mxu0 %v3121_v35  ;;  %v263_v34 = vld [vmem:[#allocation2 + $0xa8] sm:$0xff] }
 0x149   : > { %3154 = vmatprep.subr.bf16.mxu1 %v3153_v39  ;;  %v3139_v39 = vpack.c.bf16 %v426_v26, %v414_v23  ;;  %v3173_v52 = vpack.c.bf16 %v263_v34, %v251_v33  ;;  %v323_v23 = vld [vmem:[#allocation2 + $0x288] sm:$0xff]  ;;  %v337_v26 = vld [vmem:[#allocation2 + $0x2f8] sm:$0xff]  ;;  %v334_v33 = vld [vmem:[#allocation2 + $0x2e0] sm:$0xff] }
 0x14a   : > { %v324_v34 = vld [vmem:[#allocation2 + $0x290] sm:$0xff] }
 0x14b   : > { %3124 = vmatpush1.bf16.msra.mxu0 %v3123_v47 }
 0x14c   : > { %3156 = vmatpush1.bf16.msra.mxu1 %v3155_v48  ;;  %3126 = vmatprep.subr.bf16.mxu0 %v3125_v49 }
 0x14d   : > { %3158 = vmatprep.subr.bf16.mxu1 %v3157_v53  ;;  %v250_v53 = vld [vmem:[#allocation2 + $0x40] sm:$0xff] }
 0x14e   : > { %v3175_v1 = vpack.c.bf16 %v262_v54, %v250_v53  ;;  %v346_v54 = vld [vmem:[#allocation2 + $0x340] sm:$0xff] }
 0x14f   : > { %3128 = vmatpush1.bf16.msra.mxu0 %v3127_v59 }
 0x150   : > { %3160 = vmatpush1.bf16.msra.mxu1 %v3159_v60  ;;  %3130 = vmatprep.subr.bf16.mxu0 %v3129_v62  ;;  %v275_v62 = vld [vmem:[#allocation2 + $0x108] sm:$0xff] }
 0x151   : > { %v696_v14 = vpop.f32.mrb[0].mxu0  ;;  %3162 = vmatprep.subr.bf16.mxu1 %v3161_v2  ;;  %v277_v2 = vld [vmem:[#allocation2 + $0x118] sm:$0xff] }
 0x152   : > { %v773_v18 = vpop.f32.mrb[0].mxu1  ;;  %v698_v19 = vpop.f32.mrb[1].mxu0  ;;  %v2360_v35 = vrot.slane %v696_v14, 4  ;;  %v3209_v12 = vpack.c.bf16 %v289_v3, %v277_v2  ;;  %v313_v14 = vld [vmem:[#allocation2 + $0x238] sm:$0xff] }
 0x153   : > { %v775_v24 = vpop.f32.mrb[1].mxu1  ;;  %3132 = vmatpush1.bf16.msra.mxu0 %v3131_v9  ;;  %v2366_v44 = vrot.slane %v773_v18, 4  ;;  %v2363_v45 = vrot.slane %v698_v19, 4  ;;  %v3177_v9 = vpack.c.bf16 %v287_v63, %v275_v62  ;;  %v310_v18 = vld [vmem:[#allocation2 + $0x220] sm:$0xff]  ;;  %v300_v19 = vld [vmem:[#allocation2 + $0x1d0] sm:$0xff]  ;;  %v3213_v21 = vpack.c.bf16 %v313_v14, %v301_v13  ;;  %v371_v63 = vld [vmem:[#allocation2 + $0x408] sm:$0xff] }
 0x154   : > { %3164 = vmatpush1.bf16.msra.mxu1 %v3163_v10  ;;  %3134 = vmatprep.subr.bf16.mxu0 %v3133_v11  ;;  %v2369_v50 = vrot.slane %v775_v24, 4  ;;  %v288_v10 = vld [vmem:[#allocation2 + $0x170] sm:$0xff]  ;;  %v299_v11 = vld [vmem:[#allocation2 + $0x1c8] sm:$0xff]  ;;  %v3183_v29 = vpack.c.bf16 %v310_v18, %v298_v46  ;;  %v373_v3 = vld [vmem:[#allocation2 + $0x418] sm:$0xff] }
 0x155   : > { %v3630_v31 = vpop.f32.mrb[2].mxu0  ;;  %3166 = vmatprep.subr.bf16.mxu1 %v3165_v15  ;;  %v3179_v15 = vpack.c.bf16 %v286_v6, %v274_v5  ;;  %v3211_v16 = vpack.c.bf16 %v288_v10, %v276_v8  ;;  %v3181_v17 = vpack.c.bf16 %v311_v41, %v299_v11  ;;  %v335_v24 = vld [vmem:[#allocation2 + $0x2e8] sm:$0xff]  ;;  %v360_v62 = vld [vmem:[#allocation2 + $0x3b0] sm:$0xff]  ;;  %v238_v6 = vld [vmem:[#allocation4] sm:$0xf] }
 0x156   : > { %v2361_v36 = vrot.slane %v3630_v31, 4  ;;  %v3633_v37 = vpop.f32.mrb[2].mxu1  ;;  %v3635_v38 = vpop.f32.mrb[3].mxu0  ;;  %v3223_v10 = vpack.c.bf16 %v360_v62, %v348_v57  ;;  %v382_v13 = vld [vmem:[#allocation2 + $0x460] sm:$0xff]  ;;  %v372_v14 = vld [vmem:[#allocation2 + $0x410] sm:$0xff]  ;;  %v407_v46 = vld [vmem:[#allocation2 + $0x528] sm:$0xff] }
 0x157   : > { %v2367_v47 = vrot.slane %v3633_v37, 4  ;;  %v2364_v48 = vrot.slane %v3635_v38, 4  ;;  %v3639_v49 = vpop.f32.mrb[3].mxu1  ;;  %3136 = vmatpush1.bf16.msra.mxu0 %v3135_v25  ;;  %v325_v25 = vld [vmem:[#allocation2 + $0x298] sm:$0xff]  ;;  %v430_v57 = vld [vmem:[#allocation2 + $0x5e0] sm:$0xff] }
 0x158   : > { %v2370_v51 = vrot.slane %v3639_v49, 4  ;;  %3168 = vmatpush1.bf16.msra.mxu1 %v3167_v30  ;;  %3138 = vmatprep.subr.bf16.mxu0 %v3137_v61  ;;  %v3645_v55 = vsel %vm2359_vm0, %v2360_v35, %v2361_v36  ;;  %v3215_v30 = vpack.c.bf16 %v312_v22, %v300_v19  ;;  %v3185_v61 = vpack.c.bf16 %v335_v24, %v323_v23  ;;  %v397_v19 = vld [vmem:[#allocation2 + $0x4d8] sm:$0xff]  ;;  %v239_v22 = vld [vmem:[#allocation6] sm:$0xf] }
 0x159   : > { %3170 = vmatprep.subr.bf16.mxu1 %v3169_v32  ;;  %v3650_v59 = vsel %vm2359_vm0, %v2366_v44, %v2367_v47  ;;  %v3655_v60 = vsel %vm2359_vm0, %v2363_v45, %v2364_v48  ;;  %v322_v32 = vld [vmem:[#allocation2 + $0x280] sm:$0xff]  ;;  %v3217_v35 = vpack.c.bf16 %v337_v26, %v325_v25  ;;  %v361_v44 = vld [vmem:[#allocation2 + $0x3b8] sm:$0xff]  ;;  %v3669_v45 = vshrl.u32 %v2213_v27, 7 }
 0x15a   : > { %v3660_v28 = vsel %vm2359_vm0, %v2369_v50, %v2370_v51  ;;  %v3187_v50 = vpack.c.bf16 %v334_v33, %v322_v32  ;;  %v3221_v58 = vpack.c.bf16 %v361_v44, %v349_v43  ;;  %v394_v26 = vld [vmem:[#allocation2 + $0x4c0] sm:$0xff]  ;;  %v396_v32 = vld [vmem:[#allocation2 + $0x4d0] sm:$0xff] }
 0x15b   : > { %3140 = vmatpush1.bf16.msra.mxu0 %v3139_v39  ;;  %v336_v39 = vld [vmem:[#allocation2 + $0x2f0] sm:$0xff]  ;;  %v2215_v2 = vsub.s32 0, %v3669_v45  ;;  %v2223_v8 = vsub.s32 2, %v3669_v45  ;;  %v2227_v11 = vsub.s32 3, %v3669_v45 }
 0x15c   : > { %3172 = vmatpush1.bf16.msra.mxu1 %v3171_v40  ;;  %3174 = vmatprep.subr.bf16.mxu0 %v3173_v52  ;;  %v347_v40 = vld [vmem:[#allocation2 + $0x348] sm:$0xff]  ;;  %v3219_v52 = vpack.c.bf16 %v336_v39, %v324_v34  ;;  %v408_v33 = vld [vmem:[#allocation2 + $0x530] sm:$0xff] }
 0x15d   : > { %3206 = vmatprep.subr.bf16.mxu1 %v3205_v56  ;;  %v3189_v53 = vpack.c.bf16 %v359_v42, %v347_v40  ;;  %v358_v56 = vld [vmem:[#allocation2 + $0x3a0] sm:$0xff]  ;;  %v3676_v18 = vrot.slane %v238_v6, %v2215_v2  ;;  %v3678_v23 = vrot.slane %v238_v6, %v2223_v8  ;;  %v3682_v27 = vrot.slane %v238_v6, %v2227_v11  ;;  %v419_v39 = vld [vmem:[#allocation2 + $0x588] sm:$0xff]  ;;  %v421_v42 = vld [vmem:[#allocation2 + $0x598] sm:$0xff] }
 0x15e   : > { %1969 = vmatmul.mubr.f32.vlgmr.msra.gmra.mrb[16].mxu0 %v3617_v7  ;;  %v3191_v5 = vpack.c.bf16 %v358_v56, %v346_v54  ;;  %v431_v40 = vld [vmem:[#allocation2 + $0x5e8] sm:$0xff]  ;;  %v3685_v44 = vrot.slane %v239_v22, %v2215_v2  ;;  %v433_v54 = vld [vmem:[#allocation2 + $0x5f8] sm:$0xff]  ;;  %v418_v56 = vld [vmem:[#allocation2 + $0x580] sm:$0xff] }
 0x15f   : > { %2046 = vmatmul.mubr.f32.vlgmr.msra.gmra.mrb[16].mxu1 %v3617_v7  ;;  %3176 = vmatpush1.bf16.msra.mxu0 %v3175_v1  ;;  %v383_v1 = vld [vmem:[#allocation2 + $0x468] sm:$0xff] }
 0x160   : > { %3208 = vmatpush1.bf16.msra.mxu1 %v3207_v4  ;;  %1974 = vmatprep.mubr.f32.mxu0 %v3409_v0  ;;  %v385_v4 = vld [vmem:[#allocation2 + $0x478] sm:$0xff]  ;;  %v3193_v41 = vpack.c.bf16 %v383_v1, %v371_v63  ;;  %v3693_v1 = vrot.slane %v239_v22, %v2227_v11 }
 0x161   : > { %2051 = vmatprep.mubr.f32.mxu1 %v3409_v0  ;;  %3178 = vmatprep.subr.bf16.mxu0 %v3177_v9  ;;  %v2219_v9 = vsub.s32 1, %v3669_v45 }
 0x162   : > { %1975 = vmatmul.mubr.f32.gmra.mrb[18].mxu0 %v3622_v20  ;;  %3210 = vmatprep.subr.bf16.mxu1 %v3209_v12  ;;  %v370_v12 = vld [vmem:[#allocation2 + $0x400] sm:$0xff] }
 0x163   : > { %2052 = vmatmul.mubr.f32.gmra.mrb[18].mxu1 %v3622_v20  ;;  %3180 = vmatpush1.bf16.msra.mxu0 %v3179_v15  ;;  %v3225_v15 = vpack.c.bf16 %v385_v4, %v373_v3  ;;  %v3680_v24 = vrot.slane %v238_v6, %v2219_v9  ;;  %v3195_v25 = vpack.c.bf16 %v382_v13, %v370_v12  ;;  %v420_v3 = vld [vmem:[#allocation2 + $0x590] sm:$0xff] }
 0x164   : > { %3212 = vmatpush1.bf16.msra.mxu1 %v3211_v16  ;;  %3182 = vmatprep.subr.bf16.mxu0 %v3181_v17  ;;  %v384_v16 = vld [vmem:[#allocation2 + $0x470] sm:$0xff]  ;;  %v395_v17 = vld [vmem:[#allocation2 + $0x4c8] sm:$0xff]  ;;  %v3233_v12 = vpack.c.bf16 %v433_v54, %v421_v42  ;;  %v3203_v13 = vpack.c.bf16 %v430_v57, %v418_v56 }
 0x165   : > { %3214 = vmatprep.subr.bf16.mxu1 %v3213_v21  ;;  %2122 = vmatprep.mubr.f32.mxu0 %v3409_v0  ;;  %v409_v21 = vld [vmem:[#allocation2 + $0x538] sm:$0xff]  ;;  %v432_v4 = vld [vmem:[#allocation2 + $0x5f0] sm:$0xff] }
 0x166   : > { %2199 = vmatprep.mubr.f32.mxu1 %v3409_v0 }
 0x167   : > { %3184 = vmatpush1.bf16.msra.mxu0 %v3183_v29  ;;  %v3227_v29 = vpack.c.bf16 %v384_v16, %v372_v14  ;;  %v3235_v16 = vpack.c.bf16 %v432_v4, %v420_v3 }
 0x168   : > { %3216 = vmatpush1.bf16.msra.mxu1 %v3215_v30  ;;  %3186 = vmatprep.subr.bf16.mxu0 %v3185_v61  ;;  %v3197_v30 = vpack.c.bf16 %v407_v46, %v395_v17  ;;  %v406_v61 = vld [vmem:[#allocation2 + $0x520] sm:$0xff] }
 0x169   : > { %3218 = vmatprep.subr.bf16.mxu1 %v3217_v35  ;;  %v3229_v35 = vpack.c.bf16 %v409_v21, %v397_v19  ;;  %v3199_v2 = vpack.c.bf16 %v406_v61, %v394_v26 }
 0x16b   : > { %3188 = vmatpush1.bf16.msra.mxu0 %v3187_v50  ;;  %v3687_v50 = vrot.slane %v239_v22, %v2223_v8  ;;  %v3231_v8 = vpack.c.bf16 %v408_v33, %v396_v32 }
 0x16c   : > { %3220 = vmatpush1.bf16.msra.mxu1 %v3219_v52  ;;  %3190 = vmatprep.subr.bf16.mxu0 %v3189_v53  ;;  %v3689_v53 = vrot.slane %v239_v22, %v2219_v9  ;;  %v3201_v9 = vpack.c.bf16 %v431_v40, %v419_v39 }
 0x16d   : > { %3222 = vmatprep.subr.bf16.mxu1 %v3221_v58 }
 0x16f   : > { %3192 = vmatpush1.bf16.msra.mxu0 %v3191_v5 }
 0x170   : > { %3224 = vmatpush1.bf16.msra.mxu1 %v3223_v10  ;;  %3194 = vmatprep.subr.bf16.mxu0 %v3193_v41 }
 0x171   : > { %v850_v34 = vpop.f32.mrb[4].mxu0  ;;  %3226 = vmatprep.subr.bf16.mxu1 %v3225_v15 }
 0x172   : > { %v2233_v43 = vadd.f32 %v3676_v18, %v850_v34  ;;  %v927_v45 = vpop.f32.mrb[4].mxu1  ;;  %v852_v52 = vpop.f32.mrb[5].mxu0 }
 0x173   : > { %v2235_v58 = vadd.f32 %v3678_v23, %v927_v45  ;;  %v2234_v62 = vadd.f32 %v3680_v24, %v852_v52  ;;  %v929_v63 = vpop.f32.mrb[5].mxu1  ;;  %3196 = vmatpush1.bf16.msra.mxu0 %v3195_v25 }
 0x174   : > { %v2241_v5 = vmul.f32 2.0, %v2233_v43  ;;  %v2236_v6 = vadd.f32 %v3682_v27, %v929_v63  ;;  %3228 = vmatpush1.bf16.msra.mxu1 %v3227_v29  ;;  %3198 = vmatprep.subr.bf16.mxu0 %v3197_v30 }
 0x175   : > { %v2243_v10 = vmul.f32 2.0, %v2235_v58  ;;  %v2242_v41 = vmul.f32 2.0, %v2234_v62  ;;  %3230 = vmatprep.subr.bf16.mxu1 %v3229_v35  ;;  %v856_v14 = vpop.f32.mrb[6].mxu0 }
 0x176   : > { %v2270_v11 = vadd.f32 %v3685_v44, %v2241_v5  ;;  %v2244_v15 = vmul.f32 2.0, %v2236_v6  ;;  %v2237_v17 = vadd.f32 %v3676_v18, %v856_v14  ;;  %v933_v46 = vpop.f32.mrb[6].mxu1  ;;  %v858_v19 = vpop.f32.mrb[7].mxu0 }
 0x177   : > { %v2272_v21 = vadd.f32 %v3687_v50, %v2243_v10  ;;  %v2271_v22 = vadd.f32 %v3689_v53, %v2242_v41  ;;  %3200 = vmatpush1.bf16.msra.mxu0 %v3199_v2  ;;  %v2239_v25 = vadd.f32 %v3678_v23, %v933_v46  ;;  %v2238_v26 = vadd.f32 %v3680_v24, %v858_v19  ;;  %v935_v29 = vpop.f32.mrb[7].mxu1 }
 0x178   : > { %v2278_v30 = vmul.f32 %v2270_v11, %v2233_v43  ;;  %v2273_v61 = vadd.f32 %v3693_v1, %v2244_v15  ;;  %3232 = vmatpush1.bf16.msra.mxu1 %v3231_v8  ;;  %3202 = vmatprep.subr.bf16.mxu0 %v3201_v9  ;;  %v2245_v32 = vmul.f32 2.0, %v2237_v17  ;;  %v2240_v33 = vadd.f32 %v3682_v27, %v935_v29 }
 0x179   : > { %v2280_v34 = vmul.f32 %v2272_v21, %v2235_v58  ;;  %v2279_v35 = vmul.f32 %v2271_v22, %v2234_v62  ;;  %3234 = vmatprep.subr.bf16.mxu1 %v3233_v12  ;;  %v2247_v39 = vmul.f32 2.0, %v2239_v25  ;;  %v2246_v40 = vmul.f32 2.0, %v2238_v26 }
 0x17a   : > { %v2286_v42 = vadd.f32 %v2278_v30, %v2233_v43  ;;  %v2281_v45 = vmul.f32 %v2273_v61, %v2236_v6  ;;  %v2274_v52 = vadd.f32 %v3685_v44, %v2245_v32  ;;  %v2248_v54 = vmul.f32 2.0, %v2240_v33 }
 0x17b   : > { %v2288_v56 = vadd.f32 %v2280_v34, %v2235_v58  ;;  %v2287_v57 = vadd.f32 %v2279_v35, %v2234_v62  ;;  %3204 = vmatpush1.bf16.msra.mxu0 %v3203_v13  ;;  %v2276_v63 = vadd.f32 %v3687_v50, %v2247_v39  ;;  %v2275_v2 = vadd.f32 %v3689_v53, %v2246_v40 }
 0x17c   : > { %2294 = vst [vmem:[%s3708_s14] sm:$0xff] %v2286_v42  ;;  %v2289_v3 = vadd.f32 %v2281_v45, %v2236_v6  ;;  %3236 = vmatpush1.bf16.msra.mxu1 %v3235_v16  ;;  %v2282_v4 = vmul.f32 %v2274_v52, %v2237_v17  ;;  %v2277_v5 = vadd.f32 %v3693_v1, %v2248_v54 }
 0x17d   : > { %2296 = vst [vmem:[%s3708_s14 + $0x10] sm:$0xff] %v2288_v56  ;;  %2295 = vst [vmem:[%s3708_s14 + $0x8] sm:$0xff] %v2287_v57  ;;  %v2284_v43 = vmul.f32 %v2276_v63, %v2239_v25  ;;  %v2283_v58 = vmul.f32 %v2275_v2, %v2238_v26 }
 0x17e   : > { %2297 = vst [vmem:[%s3708_s14 + $0x18] sm:$0xff] %v2289_v3  ;;  %2123 = vmatmul.mubr.f32.vlgmr.msra.gmra.mrb[20].mxu0 %v3617_v7  ;;  %v2290_v62 = vadd.f32 %v2282_v4, %v2237_v17  ;;  %v2285_v8 = vmul.f32 %v2277_v5, %v2240_v33  ;;  %v2380_v17 = vsel %vm2359_vm0, %v2361_v36, 0.0  ;;  %v2383_v36 = vsel %vm2359_vm0, %v2370_v51, 0.0 }
 0x17f   : > { %2200 = vmatmul.mubr.f32.vlgmr.msra.gmra.mrb[20].mxu1 %v3617_v7  ;;  %2128 = vmatprep.mubr.f32.mxu0 %v3409_v0  ;;  %v2292_v6 = vadd.f32 %v2284_v43, %v2239_v25  ;;  %v2291_v9 = vadd.f32 %v2283_v58, %v2238_v26 }
 0x180   : > { %2205 = vmatprep.mubr.f32.mxu1 %v3409_v0  ;;  %2298 = vst [vmem:[%s3708_s14 + $0x20] sm:$0xff] %v2290_v62  ;;  %v2293_v10 = vadd.f32 %v2285_v8, %v2240_v33 }
 0x181   : > { %2300 = vst [vmem:[%s3708_s14 + $0x30] sm:$0xff] %v2292_v6  ;;  %2299 = vst [vmem:[%s3708_s14 + $0x28] sm:$0xff] %v2291_v9 }
 0x182   : > { %2129 = vmatmul.mubr.f32.gmra.mrb[22].mxu0 %v3622_v20  ;;  %2301 = vst [vmem:[%s3708_s14 + $0x38] sm:$0xff] %v2293_v10 }
 0x183   : > { %2206 = vmatmul.mubr.f32.gmra.mrb[22].mxu1 %v3622_v20 }
 0x191   : > { %v1004_v41 = vpop.f32.mrb[8].mxu0 }
 0x192   : > { %v2384_v12 = vadd.f32 %v3645_v55, %v1004_v41  ;;  %v1081_v13 = vpop.f32.mrb[8].mxu1  ;;  %v1006_v7 = vpop.f32.mrb[9].mxu0 }
 0x193   : > { %v2386_v14 = vadd.f32 %v3650_v59, %v1081_v13  ;;  %v2385_v11 = vadd.f32 %v3655_v60, %v1006_v7  ;;  %v1083_v15 = vpop.f32.mrb[9].mxu1  ;;  %v2382_v59 = vsel %vm2359_vm0, %v2367_v47, 0.0  ;;  %v2381_v60 = vsel %vm2359_vm0, %v2364_v48, 0.0 }
 0x194   : > { %v2392_v0 = vadd.f32 %v2384_v12, %v3676_v18  ;;  %v2387_v16 = vadd.f32 %v3660_v28, %v1083_v15 }
 0x195   : > { %v2394_v20 = vadd.f32 %v2386_v14, %v3678_v23  ;;  %v2393_v46 = vadd.f32 %v2385_v11, %v3680_v24  ;;  %v1010_v55 = vpop.f32.mrb[10].mxu0 }
 0x196   : > { %v2400_v19 = vmul.f32 2.0, %v2392_v0  ;;  %v2395_v28 = vadd.f32 %v2387_v16, %v3682_v27  ;;  %v2388_v21 = vadd.f32 %v2380_v17, %v1010_v55  ;;  %v1087_v31 = vpop.f32.mrb[10].mxu1  ;;  %v1012_v22 = vpop.f32.mrb[11].mxu0 }
 0x197   : > { %v2402_v25 = vmul.f32 2.0, %v2394_v20  ;;  %v2401_v26 = vmul.f32 2.0, %v2393_v46  ;;  %v2390_v29 = vadd.f32 %v2382_v59, %v1087_v31  ;;  %v2389_v37 = vadd.f32 %v2381_v60, %v1012_v22  ;;  %v1089_v30 = vpop.f32.mrb[11].mxu1 }
 0x198   : > { %v2408_v47 = vadd.f32 %v2400_v19, %v3685_v44  ;;  %v2403_v38 = vmul.f32 2.0, %v2395_v28  ;;  %v2396_v48 = vadd.f32 %v2388_v21, %v3676_v18  ;;  %v2391_v61 = vadd.f32 %v2383_v36, %v1089_v30 }
 0x199   : > { %v2410_v32 = vadd.f32 %v2402_v25, %v3687_v50  ;;  %v2409_v33 = vadd.f32 %v2401_v26, %v3689_v53  ;;  %v2398_v34 = vadd.f32 %v2390_v29, %v3678_v23  ;;  %v2397_v49 = vadd.f32 %v2389_v37, %v3680_v24 }
 0x19a   : > { %v2416_v51 = vmul.f32 %v2408_v47, %v2392_v0  ;;  %v2411_v35 = vadd.f32 %v2403_v38, %v3693_v1  ;;  %v2404_v39 = vmul.f32 2.0, %v2396_v48  ;;  %v2399_v40 = vadd.f32 %v2391_v61, %v3682_v27 }
 0x19b   : > { %v2418_v42 = vmul.f32 %v2410_v32, %v2394_v20  ;;  %v2417_v45 = vmul.f32 %v2409_v33, %v2393_v46  ;;  %v2406_v52 = vmul.f32 2.0, %v2398_v34  ;;  %v2405_v54 = vmul.f32 2.0, %v2397_v49 }
 0x19c   : > { %v2424_v56 = vadd.f32 %v2416_v51, %v2392_v0  ;;  %v2419_v57 = vmul.f32 %v2411_v35, %v2395_v28  ;;  %v2412_v63 = vadd.f32 %v2404_v39, %v3685_v44  ;;  %v2407_v2 = vmul.f32 2.0, %v2399_v40 }
 0x19d   : > { %v2426_v3 = vadd.f32 %v2418_v42, %v2394_v20  ;;  %v2425_v4 = vadd.f32 %v2417_v45, %v2393_v46  ;;  %v2414_v5 = vadd.f32 %v2406_v52, %v3687_v50  ;;  %v2413_v43 = vadd.f32 %v2405_v54, %v3689_v53 }
 0x19e   : > { %2642 = vst [vmem:[%s3708_s14 + $0x80] sm:$0xff] %v2424_v56  ;;  %v2427_v58 = vadd.f32 %v2419_v57, %v2395_v28  ;;  %v2420_v62 = vmul.f32 %v2412_v63, %v2396_v48  ;;  %v2415_v8 = vadd.f32 %v2407_v2, %v3693_v1 }
 0x19f   : > { %2644 = vst [vmem:[%s3708_s14 + $0x90] sm:$0xff] %v2426_v3  ;;  %2643 = vst [vmem:[%s3708_s14 + $0x88] sm:$0xff] %v2425_v4  ;;  %v2422_v6 = vmul.f32 %v2414_v5, %v2398_v34  ;;  %v2421_v9 = vmul.f32 %v2413_v43, %v2397_v49 }
 0x1a0   : > { %2645 = vst [vmem:[%s3708_s14 + $0x98] sm:$0xff] %v2427_v58  ;;  %v2428_v10 = vadd.f32 %v2420_v62, %v2396_v48  ;;  %v2423_v41 = vmul.f32 %v2415_v8, %v2399_v40 }
 0x1a1   : > { %v2430_v12 = vadd.f32 %v2422_v6, %v2398_v34  ;;  %v2429_v13 = vadd.f32 %v2421_v9, %v2397_v49 }
 0x1a2   : > { %2646 = vst [vmem:[%s3708_s14 + $0xa0] sm:$0xff] %v2428_v10  ;;  %v2431_v7 = vadd.f32 %v2423_v41, %v2399_v40 }
 0x1a3   : > { %2648 = vst [vmem:[%s3708_s14 + $0xb0] sm:$0xff] %v2430_v12  ;;  %2647 = vst [vmem:[%s3708_s14 + $0xa8] sm:$0xff] %v2429_v13 }
 0x1a4   : > { %2649 = vst [vmem:[%s3708_s14 + $0xb8] sm:$0xff] %v2431_v7 }
 0x211   : > { %v1816_v14 = vpop.f32.mrb[12].mxu0 }
 0x212   : > { %v1893_v11 = vpop.f32.mrb[12].mxu1  ;;  %v1818_v15 = vpop.f32.mrb[13].mxu0  ;;  %v2449_v17 = vrot.slane %v1816_v14, 4 }
 0x213   : > { %v1895_v0 = vpop.f32.mrb[13].mxu1  ;;  %v2455_v59 = vrot.slane %v1893_v11, 4  ;;  %v2452_v60 = vrot.slane %v1818_v15, 4 }
 0x214   : > { %v2458_v31 = vrot.slane %v1895_v0, 4 }
 0x215   : > { %v3768_v16 = vpop.f32.mrb[14].mxu0 }
 0x216   : > { %v2450_v20 = vrot.slane %v3768_v16, 4  ;;  %v3771_v46 = vpop.f32.mrb[14].mxu1  ;;  %v3773_v55 = vpop.f32.mrb[15].mxu0 }
 0x217   : > { %v2456_v19 = vrot.slane %v3771_v46, 4  ;;  %v2453_v28 = vrot.slane %v3773_v55, 4  ;;  %v3777_v21 = vpop.f32.mrb[15].mxu1 }
 0x218   : > { %v2459_v22 = vrot.slane %v3777_v21, 4  ;;  %v2451_v36 = vsel %vm2359_vm0, %v2449_v17, %v2450_v20 }
 0x219   : > { %v3786_v25 = vsel %vm2359_vm0, %v2455_v59, %v2456_v19  ;;  %v3791_v26 = vsel %vm2359_vm0, %v2452_v60, %v2453_v28 }
 0x21a   : > { %v3796_v29 = vsel %vm2359_vm0, %v2458_v31, %v2459_v22 }
 0x231   : > { %v1970_v37 = vpop.f32.mrb[16].mxu0 }
 0x232   : > { %v2302_v30 = vadd.f32 %v3676_v18, %v1970_v37  ;;  %v2047_v47 = vpop.f32.mrb[16].mxu1  ;;  %v1972_v38 = vpop.f32.mrb[17].mxu0 }
 0x233   : > { %v2304_v48 = vadd.f32 %v3678_v23, %v2047_v47  ;;  %v2303_v61 = vadd.f32 %v3680_v24, %v1972_v38  ;;  %v2049_v32 = vpop.f32.mrb[17].mxu1 }
 0x234   : > { %v2310_v33 = vmul.f32 2.0, %v2302_v30  ;;  %v2305_v34 = vadd.f32 %v3682_v27, %v2049_v32 }
 0x235   : > { %v2312_v49 = vmul.f32 2.0, %v2304_v48  ;;  %v2311_v51 = vmul.f32 2.0, %v2303_v61  ;;  %v1976_v35 = vpop.f32.mrb[18].mxu0 }
 0x236   : > { %v2318_v39 = vadd.f32 %v2310_v33, %v3685_v44  ;;  %v2313_v40 = vmul.f32 2.0, %v2305_v34  ;;  %v2306_v42 = vadd.f32 %v3676_v18, %v1976_v35  ;;  %v2053_v45 = vpop.f32.mrb[18].mxu1  ;;  %v1978_v52 = vpop.f32.mrb[19].mxu0 }
 0x237   : > { %v2320_v54 = vadd.f32 %v2312_v49, %v3687_v50  ;;  %v2319_v56 = vadd.f32 %v2311_v51, %v3689_v53  ;;  %v2308_v57 = vadd.f32 %v3678_v23, %v2053_v45  ;;  %v2307_v63 = vadd.f32 %v3680_v24, %v1978_v52  ;;  %v2055_v2 = vpop.f32.mrb[19].mxu1 }
 0x238   : > { %v2326_v3 = vmul.f32 %v2318_v39, %v2302_v30  ;;  %v2321_v4 = vadd.f32 %v2313_v40, %v3693_v1  ;;  %v2314_v5 = vmul.f32 2.0, %v2306_v42  ;;  %v2309_v43 = vadd.f32 %v3682_v27, %v2055_v2 }
 0x239   : > { %v2328_v58 = vmul.f32 %v2320_v54, %v2304_v48  ;;  %v2327_v62 = vmul.f32 %v2319_v56, %v2303_v61  ;;  %v2316_v8 = vmul.f32 2.0, %v2308_v57  ;;  %v2315_v6 = vmul.f32 2.0, %v2307_v63 }
 0x23a   : > { %v2334_v9 = vadd.f32 %v2326_v3, %v2302_v30  ;;  %v2329_v10 = vmul.f32 %v2321_v4, %v2305_v34  ;;  %v2322_v41 = vadd.f32 %v2314_v5, %v3685_v44  ;;  %v2317_v12 = vmul.f32 2.0, %v2309_v43 }
 0x23b   : > { %v2336_v13 = vadd.f32 %v2328_v58, %v2304_v48  ;;  %v2335_v7 = vadd.f32 %v2327_v62, %v2303_v61  ;;  %v2324_v14 = vadd.f32 %v2316_v8, %v3687_v50  ;;  %v2323_v11 = vadd.f32 %v2315_v6, %v3689_v53 }
 0x23c   : > { %2634 = vst [vmem:[%s3708_s14 + $0x40] sm:$0xff] %v2334_v9  ;;  %v2337_v15 = vadd.f32 %v2329_v10, %v2305_v34  ;;  %v2330_v0 = vmul.f32 %v2322_v41, %v2306_v42  ;;  %v2325_v17 = vadd.f32 %v2317_v12, %v3693_v1  ;;  %v2469_v40 = vsel %vm2359_vm0, %v2450_v20, 0.0 }
 0x23d   : > { %2636 = vst [vmem:[%s3708_s14 + $0x50] sm:$0xff] %v2336_v13  ;;  %2635 = vst [vmem:[%s3708_s14 + $0x48] sm:$0xff] %v2335_v7  ;;  %v2332_v59 = vmul.f32 %v2324_v14, %v2308_v57  ;;  %v2331_v60 = vmul.f32 %v2323_v11, %v2307_v63  ;;  %v2472_v20 = vsel %vm2359_vm0, %v2459_v22, 0.0 }
 0x23e   : > { %2637 = vst [vmem:[%s3708_s14 + $0x58] sm:$0xff] %v2337_v15  ;;  %v2338_v31 = vadd.f32 %v2330_v0, %v2306_v42  ;;  %v2333_v37 = vmul.f32 %v2325_v17, %v2309_v43 }
 0x23f   : > { %v2340_v30 = vadd.f32 %v2332_v59, %v2308_v57  ;;  %v2339_v47 = vadd.f32 %v2331_v60, %v2307_v63 }
 0x240   : > { %2638 = vst [vmem:[%s3708_s14 + $0x60] sm:$0xff] %v2338_v31  ;;  %v2341_v38 = vadd.f32 %v2333_v37, %v2309_v43 }
 0x241   : > { %2640 = vst [vmem:[%s3708_s14 + $0x70] sm:$0xff] %v2340_v30  ;;  %2639 = vst [vmem:[%s3708_s14 + $0x68] sm:$0xff] %v2339_v47 }
 0x242   : > { %2641 = vst [vmem:[%s3708_s14 + $0x78] sm:$0xff] %v2341_v38 }
 0x251   : > { %v2124_v48 = vpop.f32.mrb[20].mxu0 }
 0x252   : > { %v2473_v61 = vadd.f32 %v2451_v36, %v2124_v48  ;;  %v2201_v32 = vpop.f32.mrb[20].mxu1  ;;  %v2126_v33 = vpop.f32.mrb[21].mxu0 }
 0x253   : > { %v2475_v34 = vadd.f32 %v3786_v25, %v2201_v32  ;;  %v2474_v49 = vadd.f32 %v3791_v26, %v2126_v33  ;;  %v2203_v51 = vpop.f32.mrb[21].mxu1  ;;  %v2471_v25 = vsel %vm2359_vm0, %v2456_v19, 0.0  ;;  %v2470_v26 = vsel %vm2359_vm0, %v2453_v28, 0.0 }
 0x254   : > { %v2481_v35 = vadd.f32 %v2473_v61, %v3676_v18  ;;  %v2476_v39 = vadd.f32 %v3796_v29, %v2203_v51 }
 0x255   : > { %v2483_v42 = vadd.f32 %v2475_v34, %v3678_v23  ;;  %v2482_v45 = vadd.f32 %v2474_v49, %v3680_v24  ;;  %v2130_v36 = vpop.f32.mrb[22].mxu0 }
 0x256   : > { %v2489_v52 = vmul.f32 2.0, %v2481_v35  ;;  %v2484_v29 = vadd.f32 %v2476_v39, %v3682_v27  ;;  %v2477_v54 = vadd.f32 %v2469_v40, %v2130_v36  ;;  %v2207_v16 = vpop.f32.mrb[22].mxu1  ;;  %v2132_v56 = vpop.f32.mrb[23].mxu0 }
 0x257   : > { %v2491_v57 = vmul.f32 2.0, %v2483_v42  ;;  %v2490_v63 = vmul.f32 2.0, %v2482_v45  ;;  %v2479_v2 = vadd.f32 %v2471_v25, %v2207_v16  ;;  %v2478_v46 = vadd.f32 %v2470_v26, %v2132_v56  ;;  %v2209_v3 = vpop.f32.mrb[23].mxu1 }
 0x258   : > { %v2497_v19 = vadd.f32 %v2489_v52, %v3685_v44  ;;  %v2492_v55 = vmul.f32 2.0, %v2484_v29  ;;  %v2485_v28 = vadd.f32 %v2477_v54, %v3676_v18  ;;  %v2480_v4 = vadd.f32 %v2472_v20, %v2209_v3 }
 0x259   : > { %v2499_v5 = vadd.f32 %v2491_v57, %v3687_v50  ;;  %v2498_v43 = vadd.f32 %v2490_v63, %v3689_v53  ;;  %v2487_v58 = vadd.f32 %v2479_v2, %v3678_v23  ;;  %v2486_v21 = vadd.f32 %v2478_v46, %v3680_v24 }
 0x25a   : > { %v2505_v22 = vmul.f32 %v2497_v19, %v2481_v35  ;;  %v2500_v62 = vadd.f32 %v2492_v55, %v3693_v1  ;;  %v2493_v8 = vmul.f32 2.0, %v2485_v28  ;;  %v2488_v6 = vadd.f32 %v2480_v4, %v3682_v27 }
 0x25b   : > { %v2507_v9 = vmul.f32 %v2499_v5, %v2483_v42  ;;  %v2506_v10 = vmul.f32 %v2498_v43, %v2482_v45  ;;  %v2495_v18 = vmul.f32 2.0, %v2487_v58  ;;  %v2494_v41 = vmul.f32 2.0, %v2486_v21 }
 0x25c   : > { %v2513_v12 = vadd.f32 %v2505_v22, %v2481_v35  ;;  %v2508_v13 = vmul.f32 %v2500_v62, %v2484_v29  ;;  %v2501_v23 = vadd.f32 %v2493_v8, %v3685_v44  ;;  %v2496_v7 = vmul.f32 2.0, %v2488_v6 }
 0x25d   : > { %v2515_v24 = vadd.f32 %v2507_v9, %v2483_v42  ;;  %v2514_v14 = vadd.f32 %v2506_v10, %v2482_v45  ;;  %v2503_v11 = vadd.f32 %v2495_v18, %v3687_v50  ;;  %v2502_v15 = vadd.f32 %v2494_v41, %v3689_v53 }
 0x25e   : > { %2650 = vst [vmem:[%s3708_s14 + $0xc0] sm:$0xff] %v2513_v12  ;;  %v2516_v27 = vadd.f32 %v2508_v13, %v2484_v29  ;;  %v2509_v0 = vmul.f32 %v2501_v23, %v2485_v28  ;;  %v2504_v17 = vadd.f32 %v2496_v7, %v3693_v1 }
 0x25f   : > { %2652 = vst [vmem:[%s3708_s14 + $0xd0] sm:$0xff] %v2515_v24  ;;  %2651 = vst [vmem:[%s3708_s14 + $0xc8] sm:$0xff] %v2514_v14  ;;  %v2511_v59 = vmul.f32 %v2503_v11, %v2487_v58  ;;  %v2510_v44 = vmul.f32 %v2502_v15, %v2486_v21 }
 0x260   : > { %2653 = vst [vmem:[%s3708_s14 + $0xd8] sm:$0xff] %v2516_v27  ;;  %v2517_v60 = vadd.f32 %v2509_v0, %v2485_v28  ;;  %v2512_v31 = vmul.f32 %v2504_v17, %v2488_v6 }
 0x261   : > { %v2519_v37 = vadd.f32 %v2511_v59, %v2487_v58  ;;  %v2518_v30 = vadd.f32 %v2510_v44, %v2486_v21 }
 0x262   : > { %2654 = vst [vmem:[%s3708_s14 + $0xe0] sm:$0xff] %v2517_v60  ;;  %v2520_v50 = vadd.f32 %v2512_v31, %v2488_v6 }
 0x263   : > { %2656 = vst [vmem:[%s3708_s14 + $0xf0] sm:$0xff] %v2519_v37  ;;  %2655 = vst [vmem:[%s3708_s14 + $0xe8] sm:$0xff] %v2518_v30 }
 0x264   : > { %2657 = vst [vmem:[%s3708_s14 + $0xf8] sm:$0xff] %v2520_v50 }
 0x265 PF: > { %s16_s15 = sadd.s32 1, %s3402_s15  }
 0x266   : > { %p13_p3 = scmp.ge.s32.totalorder %s16_s15, 4  }
 0x268   :  { %15 = sbr.rel (!%p13_p3) target bundleno = 2 (0x2), region = 86 }
 0x26f   :  { %2551 = vsyncpa [#allocation3], 1 }
 0x270   :  { %2553 = vsyncpa [#allocation3 + $0x1], 1 }
 0x271   :  { %2554 = vsyncpa [#allocation5], 1 }

</bundles_post_ra>
